<compile_context>
chip_gen: v7x
topology: tpu7x:2x2x1
jax: 0.10.0
libtpu: 0.0.40
codegen_flags: <defaults>
</compile_context>

<pallas_src>
import jax
import jax.numpy as jnp
import numpy as np
from jax.experimental import pallas as pl
from jax.experimental.pallas import tpu as pltpu

LEAKY_SLOPE = 0.01  # torch.nn.LeakyReLU default

_VSPEC = pl.BlockSpec(memory_space=pltpu.MemorySpace.VMEM)


def _leaky_relu(x):
    return jnp.maximum(x, LEAKY_SLOPE * x)


def _dot(a, b):
    return jnp.dot(a, b, preferred_element_type=jnp.float32)


def _round8(r):
    return -(-r // 8) * 8


def _layout(blocks):
    """blocks: [(name, rows, cols)] -> (offsets {name: (row_off, rows, cols)}, total_rows, max_cols).
    Row offsets are padded to multiples of 8 so every in-kernel slice is sublane-aligned."""
    offs, off, maxc = {}, 0, 0
    for name, r, c in blocks:
        offs[name] = (off, r, c)
        off += _round8(r)
        maxc = max(maxc, c)
    return offs, off, maxc


def _mp_blocks(cfg):
    Dn, De, Dg = cfg["node_embedding_dim"], cfg["edge_embedding_dim"], cfg["global_embedding_dim"]
    He, Hn, Hg = cfg["edge_hidden_dim"], cfg["node_hidden_dim"], cfg["global_hidden_dim"]
    Det, Dnt, Dgt = cfg["edge_target_dim"], cfg["node_target_dim"], cfg["global_target_dim"]
    return [
        # EdgeModel: Lin(2Dn+De+Dg, He) pre-split into concat segments, ReLU, Lin(He, Det)
        ("ew1_src", Dn, He), ("ew1_dst", Dn, He), ("ew1_e", De, He), ("ew1_u", Dg, He),
        ("eb1", 1, He), ("ew2", He, Det), ("eb2", 1, Det),
        # NodeModel mlp1: Lin(Dn+Det, Hn) pre-split, ReLU, Lin(Hn, Hn)
        ("n1w1_x", Dn, Hn), ("n1w1_e", Det, Hn), ("n1b1", 1, Hn),
        ("n1w2", Hn, Hn), ("n1b2", 1, Hn),
        # NodeModel mlp2: Lin(Dn+Hn+Dg, Hn) pre-split, ReLU, Lin(Hn, Dnt)
        ("n2w1_x", Dn, Hn), ("n2w1_agg", Hn, Hn), ("n2w1_u", Dg, Hn), ("n2b1", 1, Hn),
        ("n2w2", Hn, Dnt), ("n2b2", 1, Dnt),
        # GlobalModel: Lin(Dg+Dnt, Hg) pre-split, ReLU, Lin(Hg, Dgt)
        ("gw1_u", Dg, Hg), ("gw1_x", Dnt, Hg), ("gb1", 1, Hg),
        ("gw2", Hg, Dgt), ("gb2", 1, Dgt),
    ]


def _other_blocks(cfg):
    return [
        ("wew", cfg["edge_feature_dim"], cfg["edge_embedding_dim"]),
        ("web", 1, cfg["edge_embedding_dim"]),
        ("wnw", cfg["node_feature_dim"], cfg["node_embedding_dim"]),
        ("wnb", 1, cfg["node_embedding_dim"]),
        ("wgw", cfg["global_feature_dim"], cfg["global_embedding_dim"]),
        ("wgb", 1, cfg["global_embedding_dim"]),
        ("wd", cfg["node_target_dim"], cfg["node_dim_out"]),
        ("bd", 1, cfg["node_dim_out"]),
        ("wv1", cfg["global_target_dim"], cfg["value_embedding_dim"]),
        ("bv1", 1, cfg["value_embedding_dim"]),
        ("wv2", cfg["value_embedding_dim"], 1),
        ("bv2", 1, 1),
    ]


# ----------------------------------------------------------------------------
# Fused forward kernel: embeddings -> n_passes MetaLayer steps -> decoder/value
# ----------------------------------------------------------------------------
def _make_kernel(cfg, N, mp_offs, oth_offs):
    n_passes = cfg["n_passes"]
    inv_n = 1.0 / float(N)

    def kernel(x_ref, e_ref, u_ref, mp_ref, oth_ref, xo_ref, vo_ref):
        def W(p, name):  # per-pass packed weight/bias block (static, sublane-aligned slice)
            off, r, c = mp_offs[name]
            return mp_ref[p, off:off + r, 0:c]

        def O(name):     # embedding / head weight/bias block
            off, r, c = oth_offs[name]
            return oth_ref[off:off + r, 0:c]

        # ---- embeddings: Linear + LeakyReLU (use_batch_norm=False branch) ----
        e = _leaky_relu(_dot(e_ref[...], O("wew")) + O("web"))   # [N*N, De]
        x = _leaky_relu(_dot(x_ref[...], O("wnw")) + O("wnb"))   # [N, Dn]
        u = _leaky_relu(_dot(u_ref[...], O("wgw")) + O("wgb"))   # [1, Dg]

        for p in range(n_passes):  # n_passes is static & small -> unrolled
            # --- EdgeModel: relu(cat[x_src, x_dst, e, u] @ W1 + b1) @ W2 + b2 ---
            # split-weight form: no [N,N,Dn] broadcast, no concat
            src_h = _dot(x, W(p, "ew1_src")) + _dot(u, W(p, "ew1_u")) + W(p, "eb1")  # [N, He]
            dst_h = _dot(x, W(p, "ew1_dst"))                                          # [N, He]
            h = (_dot(e, W(p, "ew1_e")).reshape(N, N, -1)
                 + src_h[:, None, :] + dst_h[None, :, :])
            h = jnp.maximum(h, 0.0)                                                   # [src, dst, He]
            e_new = _dot(h.reshape(N * N, -1), W(p, "ew2")) + W(p, "eb2")             # [N*N, De]

            # --- NodeModel mlp1 + scatter_mean(dst), hoisted before the 2nd matmul:
            #     mean_src(relu(h1)) @ W2 + b2  ==  mean_src(relu(h1) @ W2 + b2)
            src1 = _dot(x, W(p, "n1w1_x")) + W(p, "n1b1")                             # [N, Hn]
            h1 = _dot(e_new, W(p, "n1w1_e")).reshape(N, N, -1) + src1[:, None, :]
            h1 = jnp.maximum(h1, 0.0)                                                 # [src, dst, Hn]
            h1_mean = jnp.sum(h1, axis=0) * inv_n                                     # [N(dst), Hn] VALU reduce
            agg = _dot(h1_mean, W(p, "n1w2")) + W(p, "n1b2")                          # [N, Hn]

            # --- NodeModel mlp2: relu(cat[x, agg, u] @ W + b) @ W2 + b2 ---
            h2 = (_dot(x, W(p, "n2w1_x")) + _dot(agg, W(p, "n2w1_agg"))
                  + _dot(u, W(p, "n2w1_u")) + W(p, "n2b1"))
            h2 = jnp.maximum(h2, 0.0)
            x_new = _dot(h2, W(p, "n2w2")) + W(p, "n2b2")                             # [N, Dn]

            # --- GlobalModel: relu(cat[u, mean(x_new)] @ W + b) @ W2 + b2 ---
            x_mean = jnp.sum(x_new, axis=0, keepdims=True) * inv_n                    # [1, Dn] sublane reduce
            hg = jnp.maximum(
                _dot(u, W(p, "gw1_u")) + _dot(x_mean, W(p, "gw1_x")) + W(p, "gb1"), 0.0)
            u_new = _dot(hg, W(p, "gw2")) + W(p, "gb2")                               # [1, Dg]

            # --- residual updates (as in the reference forward) ---
            x = x + x_new
            e = e + e_new
            u = u + u_new

        # ---- node decoder (plain Linear) ----
        xo_ref[...] = (_dot(x, O("wd")) + O("bd")).astype(xo_ref.dtype)

        # ---- value critic head: Linear -> LeakyReLU -> Linear(...,1) ----
        v = _leaky_relu(_dot(u, O("wv1")) + O("bv1"))
        vo_ref[...] = (_dot(v, O("wv2")) + O("bv2")).astype(vo_ref.dtype)

    return kernel


# ----------------------------------------------------------------------------
# Parameter construction (deterministic, PyTorch Linear default init style)
# ----------------------------------------------------------------------------
def init_linear(key, fan_in, fan_out):
    kw, kb = jax.random.split(key)
    bound = 1.0 / float(np.sqrt(fan_in))
    w = jax.random.uniform(kw, (fan_in, fan_out), jnp.float32, -bound, bound)
    b = jax.random.uniform(kb, (1, fan_out), jnp.float32, -bound, bound)
    return w, b


def build_params(cfg, key):
    keys = iter(jax.random.split(key, 64))
    P = {}
    P["edge_emb"] = init_linear(next(keys), cfg["edge_feature_dim"], cfg["edge_embedding_dim"])
    P["node_emb"] = init_linear(next(keys), cfg["node_feature_dim"], cfg["node_embedding_dim"])
    P["glob_emb"] = init_linear(next(keys), cfg["global_feature_dim"], cfg["global_embedding_dim"])

    Dn, De, Dg = cfg["node_embedding_dim"], cfg["edge_embedding_dim"], cfg["global_embedding_dim"]
    He, Hn, Hg = cfg["edge_hidden_dim"], cfg["node_hidden_dim"], cfg["global_hidden_dim"]

    mp_params = []
    for _ in range(cfg["n_passes"]):
        p = {}
        p["ew1"], p["eb1"] = init_linear(next(keys), 2 * Dn + De + Dg, He)
        p["ew2"], p["eb2"] = init_linear(next(keys), He, cfg["edge_target_dim"])
        p["n1w1"], p["n1b1"] = init_linear(next(keys), Dn + cfg["edge_target_dim"], Hn)
        p["n1w2"], p["n1b2"] = init_linear(next(keys), Hn, Hn)
        p["n2w1"], p["n2b1"] = init_linear(next(keys), Dn + Hn + Dg, Hn)
        p["n2w2"], p["n2b2"] = init_linear(next(keys), Hn, cfg["node_target_dim"])
        p["gw1"], p["gb1"] = init_linear(next(keys), Dg + cfg["node_target_dim"], Hg)
        p["gw2"], p["gb2"] = init_linear(next(keys), Hg, cfg["global_target_dim"])
        mp_params.append(p)
    P["mp"] = mp_params

    P["decoder"] = init_linear(next(keys), cfg["node_target_dim"], cfg["node_dim_out"])
    P["value1"] = init_linear(next(keys), cfg["global_target_dim"], cfg["value_embedding_dim"])
    P["value2"] = init_linear(next(keys), cfg["value_embedding_dim"], 1)
    return P


def pack_params(params, cfg):
    """One-time host-side packing of every weight/bias into two VMEM slabs:
    mp_slab [n_passes, R_mp, C_mp] and other_slab [R_oth, C_oth].
    Concat weights are pre-split into their segments so the kernel never slices rows of
    a logical concat, only aligned packed blocks."""
    Dn, De, Dg = cfg["node_embedding_dim"], cfg["edge_embedding_dim"], cfg["global_embedding_dim"]
    Hn = cfg["node_hidden_dim"]
    n_passes = cfg["n_passes"]

    mp_offs, mp_rows, mp_cols = _layout(_mp_blocks(cfg))
    oth_offs, oth_rows, oth_cols = _layout(_other_blocks(cfg))

    mp_slab = np.zeros((n_passes, mp_rows, mp_cols), np.float32)
    for i, p in enumerate(params["mp"]):
        ew1 = np.asarray(p["ew1"])
        n1w1 = np.asarray(p["n1w1"])
        n2w1 = np.asarray(p["n2w1"])
        gw1 = np.asarray(p["gw1"])
        segs = {
            "ew1_src": ew1[0:Dn], "ew1_dst": ew1[Dn:2 * Dn],
            "ew1_e": ew1[2 * Dn:2 * Dn + De], "ew1_u": ew1[2 * Dn + De:],
            "eb1": p["eb1"], "ew2": p["ew2"], "eb2": p["eb2"],
            "n1w1_x": n1w1[0:Dn], "n1w1_e": n1w1[Dn:],
            "n1b1": p["n1b1"], "n1w2": p["n1w2"], "n1b2": p["n1b2"],
            "n2w1_x": n2w1[0:Dn], "n2w1_agg": n2w1[Dn:Dn + Hn], "n2w1_u": n2w1[Dn + Hn:],
            "n2b1": p["n2b1"], "n2w2": p["n2w2"], "n2b2": p["n2b2"],
            "gw1_u": gw1[0:Dg], "gw1_x": gw1[Dg:],
            "gb1": p["gb1"], "gw2": p["gw2"], "gb2": p["gb2"],
        }
        for name, arr in segs.items():
            off, r, c = mp_offs[name]
            mp_slab[i, off:off + r, 0:c] = np.asarray(arr)

    oth_slab = np.zeros((oth_rows, oth_cols), np.float32)
    named = {
        "wew": params["edge_emb"][0], "web": params["edge_emb"][1],
        "wnw": params["node_emb"][0], "wnb": params["node_emb"][1],
        "wgw": params["glob_emb"][0], "wgb": params["glob_emb"][1],
        "wd": params["decoder"][0], "bd": params["decoder"][1],
        "wv1": params["value1"][0], "bv1": params["value1"][1],
        "wv2": params["value2"][0], "bv2": params["value2"][1],
    }
    for name, arr in named.items():
        off, r, c = oth_offs[name]
        oth_slab[off:off + r, 0:c] = np.asarray(arr)

    return jnp.asarray(mp_slab), jnp.asarray(oth_slab)


# ----------------------------------------------------------------------------
# Forward pass builder (mirrors PolicyFullyConnectedMessagePassing.forward)
# ----------------------------------------------------------------------------
def make_forward(cfg, N):
    # residual updates x+x_new / e+e_new / u+u_new require target == embedding dims
    assert cfg["edge_target_dim"] == cfg["edge_embedding_dim"]
    assert cfg["node_target_dim"] == cfg["node_embedding_dim"]
    assert cfg["global_target_dim"] == cfg["global_embedding_dim"]

    mp_offs, _, _ = _layout(_mp_blocks(cfg))
    oth_offs, _, _ = _layout(_other_blocks(cfg))
    kernel = _make_kernel(cfg, N, mp_offs, oth_offs)

    call = pl.pallas_call(
        kernel,
        out_shape=(
            jax.ShapeDtypeStruct((N, cfg["node_dim_out"]), jnp.float32),
            jax.ShapeDtypeStruct((1, 1), jnp.float32),
        ),
        in_specs=[_VSPEC] * 5,
        out_specs=(_VSPEC, _VSPEC),
        compiler_params=pltpu.CompilerParams(vmem_limit_bytes=32 * 1024 * 1024),
    )

    @jax.jit
    def forward(x, edge_attr, u, mp_slab, other_slab):
        e_flat = edge_attr.reshape(N * N, edge_attr.shape[-1])
        return call(x, e_flat, u, mp_slab, other_slab)

    return forward


if __name__ == "__main__":
    cfg = dict(
        n_passes=2,
        use_value_critic=True,
        use_batch_norm=False,
        logit_normalizer=10.0,
        node_feature_dim=8,
        edge_feature_dim=4,
        global_feature_dim=4,
        node_embedding_dim=16,
        edge_embedding_dim=16,
        global_embedding_dim=16,
        node_hidden_dim=32,
        edge_hidden_dim=32,
        global_hidden_dim=32,
        node_target_dim=16,     # == node_embedding_dim (needed for residual)
        edge_target_dim=16,     # == edge_embedding_dim
        global_target_dim=16,   # == global_embedding_dim
        node_dim_out=1,
        value_embedding_dim=16,
    )

    N = 8  # nodes in the (single) fully connected graph; E = N*N edges
    key = jax.random.PRNGKey(0)
    k_param, k_x, k_e, k_u = jax.random.split(key, 4)

    params = build_params(cfg, k_param)
    mp_slab, other_slab = pack_params(params, cfg)   # one-time parameter-prep
    forward = make_forward(cfg, N)                   # jitted; no per-call host prep

    x = jax.random.normal(k_x, (N, cfg["node_feature_dim"]), jnp.float32)
    edge_attr = jax.random.normal(k_e, (N, N, cfg["edge_feature_dim"]), jnp.float32)
    u = jax.random.normal(k_u, (1, cfg["global_feature_dim"]), jnp.float32)

    x_out, value_out = forward(x, edge_attr, u, mp_slab, other_slab)
    jax.block_until_ready((x_out, value_out))
    assert x_out.shape == (N, cfg["node_dim_out"])
    assert value_out.shape == (1, 1)
    assert bool(jnp.all(jnp.isfinite(x_out))) and bool(jnp.all(jnp.isfinite(value_out)))
    print("KERNEL_OK")
</pallas_src>

<mosaic_0001>
module attributes {stable_mosaic.version = 11 : i64} {
  func.func @kernel(%arg0: memref<8x8xf32, #tpu.memory_space<vmem>>, %arg1: memref<64x4xf32, #tpu.memory_space<vmem>>, %arg2: memref<1x4xf32, #tpu.memory_space<vmem>>, %arg3: memref<2x384x32xf32, #tpu.memory_space<vmem>>, %arg4: memref<120x16xf32, #tpu.memory_space<vmem>>, %arg5: memref<8x1xf32, #tpu.memory_space<vmem>>, %arg6: memref<1x1xf32, #tpu.memory_space<vmem>>) attributes {dimension_semantics = [], scalar_prefetch = 0 : i64, scratch_operands = 0 : i64, tpu.core_type = #tpu.core_type<tc>} {
    %c0 = arith.constant 0 : index
    %c0_0 = arith.constant 0 : index
    %0 = vector.load %arg1[%c0, %c0_0] : memref<64x4xf32, #tpu.memory_space<vmem>>, vector<64x4xf32>
    %c0_1 = arith.constant 0 : index
    %c0_2 = arith.constant 0 : index
    %1 = vector.load %arg4[%c0_1, %c0_2] : memref<120x16xf32, #tpu.memory_space<vmem>>, vector<4x16xf32>
    %cst = arith.constant dense<0.000000e+00> : vector<64x16xf32>
    %2 = tpu.matmul %0, %1, %cst {dimension_numbers = #tpu.dot_dimension_numbers<[1], [0], [0], [1], [0, 0, 1, 1], [], []>} : vector<64x4xf32>, vector<4x16xf32>, vector<64x16xf32> -> vector<64x16xf32>
    %c8 = arith.constant 8 : index
    %c0_3 = arith.constant 0 : index
    %3 = vector.load %arg4[%c8, %c0_3] : memref<120x16xf32, #tpu.memory_space<vmem>>, vector<1x16xf32>
    %4 = vector.broadcast %3 : vector<1x16xf32> to vector<64x16xf32>
    %5 = arith.addf %2, %4 : vector<64x16xf32>
    %cst_4 = arith.constant 0.00999999977 : f32
    %6 = vector.broadcast %cst_4 : f32 to vector<64x16xf32>
    %7 = arith.mulf %6, %5 : vector<64x16xf32>
    %8 = arith.maximumf %5, %7 : vector<64x16xf32>
    %c0_5 = arith.constant 0 : index
    %c0_6 = arith.constant 0 : index
    %9 = vector.load %arg0[%c0_5, %c0_6] : memref<8x8xf32, #tpu.memory_space<vmem>>, vector<8x8xf32>
    %c16 = arith.constant 16 : index
    %c0_7 = arith.constant 0 : index
    %10 = vector.load %arg4[%c16, %c0_7] : memref<120x16xf32, #tpu.memory_space<vmem>>, vector<8x16xf32>
    %cst_8 = arith.constant dense<0.000000e+00> : vector<8x16xf32>
    %11 = tpu.matmul %9, %10, %cst_8 {dimension_numbers = #tpu.dot_dimension_numbers<[1], [0], [0], [1], [0, 0, 1, 1], [], []>} : vector<8x8xf32>, vector<8x16xf32>, vector<8x16xf32> -> vector<8x16xf32>
    %c24 = arith.constant 24 : index
    %c0_9 = arith.constant 0 : index
    %12 = vector.load %arg4[%c24, %c0_9] : memref<120x16xf32, #tpu.memory_space<vmem>>, vector<1x16xf32>
    %13 = vector.broadcast %12 : vector<1x16xf32> to vector<8x16xf32>
    %14 = arith.addf %11, %13 : vector<8x16xf32>
    %cst_10 = arith.constant 0.00999999977 : f32
    %15 = vector.broadcast %cst_10 : f32 to vector<8x16xf32>
    %16 = arith.mulf %15, %14 : vector<8x16xf32>
    %17 = arith.maximumf %14, %16 : vector<8x16xf32>
    %c0_11 = arith.constant 0 : index
    %c0_12 = arith.constant 0 : index
    %18 = vector.load %arg2[%c0_11, %c0_12] : memref<1x4xf32, #tpu.memory_space<vmem>>, vector<1x4xf32>
    %c32 = arith.constant 32 : index
    %c0_13 = arith.constant 0 : index
    %19 = vector.load %arg4[%c32, %c0_13] : memref<120x16xf32, #tpu.memory_space<vmem>>, vector<4x16xf32>
    %cst_14 = arith.constant dense<0.000000e+00> : vector<1x16xf32>
    %20 = tpu.matmul %18, %19, %cst_14 {dimension_numbers = #tpu.dot_dimension_numbers<[1], [0], [0], [1], [0, 0, 1, 1], [], []>} : vector<1x4xf32>, vector<4x16xf32>, vector<1x16xf32> -> vector<1x16xf32>
    %c40 = arith.constant 40 : index
    %c0_15 = arith.constant 0 : index
    %21 = vector.load %arg4[%c40, %c0_15] : memref<120x16xf32, #tpu.memory_space<vmem>>, vector<1x16xf32>
    %22 = arith.addf %20, %21 : vector<1x16xf32>
    %cst_16 = arith.constant 0.00999999977 : f32
    %23 = vector.broadcast %cst_16 : f32 to vector<1x16xf32>
    %24 = arith.mulf %23, %22 : vector<1x16xf32>
    %25 = arith.maximumf %22, %24 : vector<1x16xf32>
    %c0_17 = arith.constant 0 : index
    %c0_18 = arith.constant 0 : index
    %c0_19 = arith.constant 0 : index
    %26 = vector.load %arg3[%c0_17, %c0_18, %c0_19] : memref<2x384x32xf32, #tpu.memory_space<vmem>>, vector<1x16x32xf32>
    %27 = vector.shape_cast %26 : vector<1x16x32xf32> to vector<16x32xf32>
    %cst_20 = arith.constant dense<0.000000e+00> : vector<8x32xf32>
    %28 = tpu.matmul %17, %27, %cst_20 {dimension_numbers = #tpu.dot_dimension_numbers<[1], [0], [0], [1], [0, 0, 1, 1], [], []>} : vector<8x16xf32>, vector<16x32xf32>, vector<8x32xf32> -> vector<8x32xf32>
    %c0_21 = arith.constant 0 : index
    %c48 = arith.constant 48 : index
    %c0_22 = arith.constant 0 : index
    %29 = vector.load %arg3[%c0_21, %c48, %c0_22] : memref<2x384x32xf32, #tpu.memory_space<vmem>>, vector<1x16x32xf32>
    %30 = vector.shape_cast %29 : vector<1x16x32xf32> to vector<16x32xf32>
    %cst_23 = arith.constant dense<0.000000e+00> : vector<1x32xf32>
    %31 = tpu.matmul %25, %30, %cst_23 {dimension_numbers = #tpu.dot_dimension_numbers<[1], [0], [0], [1], [0, 0, 1, 1], [], []>} : vector<1x16xf32>, vector<16x32xf32>, vector<1x32xf32> -> vector<1x32xf32>
    %32 = vector.broadcast %31 : vector<1x32xf32> to vector<8x32xf32>
    %33 = arith.addf %28, %32 : vector<8x32xf32>
    %c0_24 = arith.constant 0 : index
    %c64 = arith.constant 64 : index
    %c0_25 = arith.constant 0 : index
    %34 = vector.load %arg3[%c0_24, %c64, %c0_25] : memref<2x384x32xf32, #tpu.memory_space<vmem>>, vector<1x1x32xf32>
    %35 = vector.shape_cast %34 : vector<1x1x32xf32> to vector<1x32xf32>
    %36 = vector.broadcast %35 : vector<1x32xf32> to vector<8x32xf32>
    %37 = arith.addf %33, %36 : vector<8x32xf32>
    %c0_26 = arith.constant 0 : index
    %c16_27 = arith.constant 16 : index
    %c0_28 = arith.constant 0 : index
    %38 = vector.load %arg3[%c0_26, %c16_27, %c0_28] : memref<2x384x32xf32, #tpu.memory_space<vmem>>, vector<1x16x32xf32>
    %39 = vector.shape_cast %38 : vector<1x16x32xf32> to vector<16x32xf32>
    %cst_29 = arith.constant dense<0.000000e+00> : vector<8x32xf32>
    %40 = tpu.matmul %17, %39, %cst_29 {dimension_numbers = #tpu.dot_dimension_numbers<[1], [0], [0], [1], [0, 0, 1, 1], [], []>} : vector<8x16xf32>, vector<16x32xf32>, vector<8x32xf32> -> vector<8x32xf32>
    %c0_30 = arith.constant 0 : index
    %c32_31 = arith.constant 32 : index
    %c0_32 = arith.constant 0 : index
    %41 = vector.load %arg3[%c0_30, %c32_31, %c0_32] : memref<2x384x32xf32, #tpu.memory_space<vmem>>, vector<1x16x32xf32>
    %42 = vector.shape_cast %41 : vector<1x16x32xf32> to vector<16x32xf32>
    %cst_33 = arith.constant dense<0.000000e+00> : vector<64x32xf32>
    %43 = tpu.matmul %8, %42, %cst_33 {dimension_numbers = #tpu.dot_dimension_numbers<[1], [0], [0], [1], [0, 0, 1, 1], [], []>} : vector<64x16xf32>, vector<16x32xf32>, vector<64x32xf32> -> vector<64x32xf32>
    %44 = vector.shape_cast %43 : vector<64x32xf32> to vector<8x8x32xf32>
    %45 = vector.shape_cast %37 : vector<8x32xf32> to vector<8x1x32xf32>
    %46 = vector.broadcast %45 : vector<8x1x32xf32> to vector<8x8x32xf32>
    %47 = arith.addf %44, %46 : vector<8x8x32xf32>
    %48 = vector.shape_cast %40 : vector<8x32xf32> to vector<1x8x32xf32>
    %49 = vector.broadcast %48 : vector<1x8x32xf32> to vector<8x8x32xf32>
    %50 = arith.addf %47, %49 : vector<8x8x32xf32>
    %cst_34 = arith.constant 0.000000e+00 : f32
    %51 = vector.broadcast %cst_34 : f32 to vector<8x8x32xf32>
    %52 = arith.maximumf %50, %51 : vector<8x8x32xf32>
    %53 = vector.shape_cast %52 : vector<8x8x32xf32> to vector<64x32xf32>
    %c0_35 = arith.constant 0 : index
    %c72 = arith.constant 72 : index
    %c0_36 = arith.constant 0 : index
    %54 = vector.load %arg3[%c0_35, %c72, %c0_36] : memref<2x384x32xf32, #tpu.memory_space<vmem>>, vector<1x32x16xf32>
    %55 = vector.shape_cast %54 : vector<1x32x16xf32> to vector<32x16xf32>
    %cst_37 = arith.constant dense<0.000000e+00> : vector<64x16xf32>
    %56 = tpu.matmul %53, %55, %cst_37 {dimension_numbers = #tpu.dot_dimension_numbers<[1], [0], [0], [1], [0, 0, 1, 1], [], []>} : vector<64x32xf32>, vector<32x16xf32>, vector<64x16xf32> -> vector<64x16xf32>
    %c0_38 = arith.constant 0 : index
    %c104 = arith.constant 104 : index
    %c0_39 = arith.constant 0 : index
    %57 = vector.load %arg3[%c0_38, %c104, %c0_39] : memref<2x384x32xf32, #tpu.memory_space<vmem>>, vector<1x1x16xf32>
    %58 = vector.shape_cast %57 : vector<1x1x16xf32> to vector<1x16xf32>
    %59 = vector.broadcast %58 : vector<1x16xf32> to vector<64x16xf32>
    %60 = arith.addf %56, %59 : vector<64x16xf32>
    %c0_40 = arith.constant 0 : index
    %c112 = arith.constant 112 : index
    %c0_41 = arith.constant 0 : index
    %61 = vector.load %arg3[%c0_40, %c112, %c0_41] : memref<2x384x32xf32, #tpu.memory_space<vmem>>, vector<1x16x32xf32>
    %62 = vector.shape_cast %61 : vector<1x16x32xf32> to vector<16x32xf32>
    %cst_42 = arith.constant dense<0.000000e+00> : vector<8x32xf32>
    %63 = tpu.matmul %17, %62, %cst_42 {dimension_numbers = #tpu.dot_dimension_numbers<[1], [0], [0], [1], [0, 0, 1, 1], [], []>} : vector<8x16xf32>, vector<16x32xf32>, vector<8x32xf32> -> vector<8x32xf32>
    %c0_43 = arith.constant 0 : index
    %c144 = arith.constant 144 : index
    %c0_44 = arith.constant 0 : index
    %64 = vector.load %arg3[%c0_43, %c144, %c0_44] : memref<2x384x32xf32, #tpu.memory_space<vmem>>, vector<1x1x32xf32>
    %65 = vector.shape_cast %64 : vector<1x1x32xf32> to vector<1x32xf32>
    %66 = vector.broadcast %65 : vector<1x32xf32> to vector<8x32xf32>
    %67 = arith.addf %63, %66 : vector<8x32xf32>
    %c0_45 = arith.constant 0 : index
    %c128 = arith.constant 128 : index
    %c0_46 = arith.constant 0 : index
    %68 = vector.load %arg3[%c0_45, %c128, %c0_46] : memref<2x384x32xf32, #tpu.memory_space<vmem>>, vector<1x16x32xf32>
    %69 = vector.shape_cast %68 : vector<1x16x32xf32> to vector<16x32xf32>
    %cst_47 = arith.constant dense<0.000000e+00> : vector<64x32xf32>
    %70 = tpu.matmul %60, %69, %cst_47 {dimension_numbers = #tpu.dot_dimension_numbers<[1], [0], [0], [1], [0, 0, 1, 1], [], []>} : vector<64x16xf32>, vector<16x32xf32>, vector<64x32xf32> -> vector<64x32xf32>
    %71 = vector.shape_cast %70 : vector<64x32xf32> to vector<8x8x32xf32>
    %72 = vector.shape_cast %67 : vector<8x32xf32> to vector<8x1x32xf32>
    %73 = vector.broadcast %72 : vector<8x1x32xf32> to vector<8x8x32xf32>
    %74 = arith.addf %71, %73 : vector<8x8x32xf32>
    %cst_48 = arith.constant 0.000000e+00 : f32
    %75 = vector.broadcast %cst_48 : f32 to vector<8x8x32xf32>
    %76 = arith.maximumf %74, %75 : vector<8x8x32xf32>
    %cst_49 = arith.constant dense<0.000000e+00> : vector<8x32xf32>
    %77 = vector.multi_reduction <add>, %76, %cst_49 [0] : vector<8x8x32xf32> to vector<8x32xf32>
    %cst_50 = arith.constant 1.250000e-01 : f32
    %78 = vector.broadcast %cst_50 : f32 to vector<8x32xf32>
    %79 = arith.mulf %77, %78 : vector<8x32xf32>
    %c0_51 = arith.constant 0 : index
    %c152 = arith.constant 152 : index
    %c0_52 = arith.constant 0 : index
    %80 = vector.load %arg3[%c0_51, %c152, %c0_52] : memref<2x384x32xf32, #tpu.memory_space<vmem>>, vector<1x32x32xf32>
    %81 = vector.shape_cast %80 : vector<1x32x32xf32> to vector<32x32xf32>
    %cst_53 = arith.constant dense<0.000000e+00> : vector<8x32xf32>
    %82 = tpu.matmul %79, %81, %cst_53 {dimension_numbers = #tpu.dot_dimension_numbers<[1], [0], [0], [1], [0, 0, 1, 1], [], []>} : vector<8x32xf32>, vector<32x32xf32>, vector<8x32xf32> -> vector<8x32xf32>
    %c0_54 = arith.constant 0 : index
    %c184 = arith.constant 184 : index
    %c0_55 = arith.constant 0 : index
    %83 = vector.load %arg3[%c0_54, %c184, %c0_55] : memref<2x384x32xf32, #tpu.memory_space<vmem>>, vector<1x1x32xf32>
    %84 = vector.shape_cast %83 : vector<1x1x32xf32> to vector<1x32xf32>
    %85 = vector.broadcast %84 : vector<1x32xf32> to vector<8x32xf32>
    %86 = arith.addf %82, %85 : vector<8x32xf32>
    %c0_56 = arith.constant 0 : index
    %c192 = arith.constant 192 : index
    %c0_57 = arith.constant 0 : index
    %87 = vector.load %arg3[%c0_56, %c192, %c0_57] : memref<2x384x32xf32, #tpu.memory_space<vmem>>, vector<1x16x32xf32>
    %88 = vector.shape_cast %87 : vector<1x16x32xf32> to vector<16x32xf32>
    %cst_58 = arith.constant dense<0.000000e+00> : vector<8x32xf32>
    %89 = tpu.matmul %17, %88, %cst_58 {dimension_numbers = #tpu.dot_dimension_numbers<[1], [0], [0], [1], [0, 0, 1, 1], [], []>} : vector<8x16xf32>, vector<16x32xf32>, vector<8x32xf32> -> vector<8x32xf32>
    %c0_59 = arith.constant 0 : index
    %c208 = arith.constant 208 : index
    %c0_60 = arith.constant 0 : index
    %90 = vector.load %arg3[%c0_59, %c208, %c0_60] : memref<2x384x32xf32, #tpu.memory_space<vmem>>, vector<1x32x32xf32>
    %91 = vector.shape_cast %90 : vector<1x32x32xf32> to vector<32x32xf32>
    %cst_61 = arith.constant dense<0.000000e+00> : vector<8x32xf32>
    %92 = tpu.matmul %86, %91, %cst_61 {dimension_numbers = #tpu.dot_dimension_numbers<[1], [0], [0], [1], [0, 0, 1, 1], [], []>} : vector<8x32xf32>, vector<32x32xf32>, vector<8x32xf32> -> vector<8x32xf32>
    %93 = arith.addf %89, %92 : vector<8x32xf32>
    %c0_62 = arith.constant 0 : index
    %c240 = arith.constant 240 : index
    %c0_63 = arith.constant 0 : index
    %94 = vector.load %arg3[%c0_62, %c240, %c0_63] : memref<2x384x32xf32, #tpu.memory_space<vmem>>, vector<1x16x32xf32>
    %95 = vector.shape_cast %94 : vector<1x16x32xf32> to vector<16x32xf32>
    %cst_64 = arith.constant dense<0.000000e+00> : vector<1x32xf32>
    %96 = tpu.matmul %25, %95, %cst_64 {dimension_numbers = #tpu.dot_dimension_numbers<[1], [0], [0], [1], [0, 0, 1, 1], [], []>} : vector<1x16xf32>, vector<16x32xf32>, vector<1x32xf32> -> vector<1x32xf32>
    %97 = vector.broadcast %96 : vector<1x32xf32> to vector<8x32xf32>
    %98 = arith.addf %93, %97 : vector<8x32xf32>
    %c0_65 = arith.constant 0 : index
    %c256 = arith.constant 256 : index
    %c0_66 = arith.constant 0 : index
    %99 = vector.load %arg3[%c0_65, %c256, %c0_66] : memref<2x384x32xf32, #tpu.memory_space<vmem>>, vector<1x1x32xf32>
    %100 = vector.shape_cast %99 : vector<1x1x32xf32> to vector<1x32xf32>
    %101 = vector.broadcast %100 : vector<1x32xf32> to vector<8x32xf32>
    %102 = arith.addf %98, %101 : vector<8x32xf32>
    %cst_67 = arith.constant 0.000000e+00 : f32
    %103 = vector.broadcast %cst_67 : f32 to vector<8x32xf32>
    %104 = arith.maximumf %102, %103 : vector<8x32xf32>
    %c0_68 = arith.constant 0 : index
    %c264 = arith.constant 264 : index
    %c0_69 = arith.constant 0 : index
    %105 = vector.load %arg3[%c0_68, %c264, %c0_69] : memref<2x384x32xf32, #tpu.memory_space<vmem>>, vector<1x32x16xf32>
    %106 = vector.shape_cast %105 : vector<1x32x16xf32> to vector<32x16xf32>
    %cst_70 = arith.constant dense<0.000000e+00> : vector<8x16xf32>
    %107 = tpu.matmul %104, %106, %cst_70 {dimension_numbers = #tpu.dot_dimension_numbers<[1], [0], [0], [1], [0, 0, 1, 1], [], []>} : vector<8x32xf32>, vector<32x16xf32>, vector<8x16xf32> -> vector<8x16xf32>
    %c0_71 = arith.constant 0 : index
    %c296 = arith.constant 296 : index
    %c0_72 = arith.constant 0 : index
    %108 = vector.load %arg3[%c0_71, %c296, %c0_72] : memref<2x384x32xf32, #tpu.memory_space<vmem>>, vector<1x1x16xf32>
    %109 = vector.shape_cast %108 : vector<1x1x16xf32> to vector<1x16xf32>
    %110 = vector.broadcast %109 : vector<1x16xf32> to vector<8x16xf32>
    %111 = arith.addf %107, %110 : vector<8x16xf32>
    %cst_73 = arith.constant dense<0.000000e+00> : vector<16xf32>
    %112 = vector.multi_reduction <add>, %111, %cst_73 [0] : vector<8x16xf32> to vector<16xf32>
    %113 = vector.shape_cast %112 : vector<16xf32> to vector<1x16xf32>
    %cst_74 = arith.constant 1.250000e-01 : f32
    %114 = vector.broadcast %cst_74 : f32 to vector<1x16xf32>
    %115 = arith.mulf %113, %114 : vector<1x16xf32>
    %c0_75 = arith.constant 0 : index
    %c304 = arith.constant 304 : index
    %c0_76 = arith.constant 0 : index
    %116 = vector.load %arg3[%c0_75, %c304, %c0_76] : memref<2x384x32xf32, #tpu.memory_space<vmem>>, vector<1x16x32xf32>
    %117 = vector.shape_cast %116 : vector<1x16x32xf32> to vector<16x32xf32>
    %cst_77 = arith.constant dense<0.000000e+00> : vector<1x32xf32>
    %118 = tpu.matmul %25, %117, %cst_77 {dimension_numbers = #tpu.dot_dimension_numbers<[1], [0], [0], [1], [0, 0, 1, 1], [], []>} : vector<1x16xf32>, vector<16x32xf32>, vector<1x32xf32> -> vector<1x32xf32>
    %c0_78 = arith.constant 0 : index
    %c320 = arith.constant 320 : index
    %c0_79 = arith.constant 0 : index
    %119 = vector.load %arg3[%c0_78, %c320, %c0_79] : memref<2x384x32xf32, #tpu.memory_space<vmem>>, vector<1x16x32xf32>
    %120 = vector.shape_cast %119 : vector<1x16x32xf32> to vector<16x32xf32>
    %cst_80 = arith.constant dense<0.000000e+00> : vector<1x32xf32>
    %121 = tpu.matmul %115, %120, %cst_80 {dimension_numbers = #tpu.dot_dimension_numbers<[1], [0], [0], [1], [0, 0, 1, 1], [], []>} : vector<1x16xf32>, vector<16x32xf32>, vector<1x32xf32> -> vector<1x32xf32>
    %122 = arith.addf %118, %121 : vector<1x32xf32>
    %c0_81 = arith.constant 0 : index
    %c336 = arith.constant 336 : index
    %c0_82 = arith.constant 0 : index
    %123 = vector.load %arg3[%c0_81, %c336, %c0_82] : memref<2x384x32xf32, #tpu.memory_space<vmem>>, vector<1x1x32xf32>
    %124 = vector.shape_cast %123 : vector<1x1x32xf32> to vector<1x32xf32>
    %125 = arith.addf %122, %124 : vector<1x32xf32>
    %cst_83 = arith.constant 0.000000e+00 : f32
    %126 = vector.broadcast %cst_83 : f32 to vector<1x32xf32>
    %127 = arith.maximumf %125, %126 : vector<1x32xf32>
    %c0_84 = arith.constant 0 : index
    %c344 = arith.constant 344 : index
    %c0_85 = arith.constant 0 : index
    %128 = vector.load %arg3[%c0_84, %c344, %c0_85] : memref<2x384x32xf32, #tpu.memory_space<vmem>>, vector<1x32x16xf32>
    %129 = vector.shape_cast %128 : vector<1x32x16xf32> to vector<32x16xf32>
    %cst_86 = arith.constant dense<0.000000e+00> : vector<1x16xf32>
    %130 = tpu.matmul %127, %129, %cst_86 {dimension_numbers = #tpu.dot_dimension_numbers<[1], [0], [0], [1], [0, 0, 1, 1], [], []>} : vector<1x32xf32>, vector<32x16xf32>, vector<1x16xf32> -> vector<1x16xf32>
    %c0_87 = arith.constant 0 : index
    %c376 = arith.constant 376 : index
    %c0_88 = arith.constant 0 : index
    %131 = vector.load %arg3[%c0_87, %c376, %c0_88] : memref<2x384x32xf32, #tpu.memory_space<vmem>>, vector<1x1x16xf32>
    %132 = vector.shape_cast %131 : vector<1x1x16xf32> to vector<1x16xf32>
    %133 = arith.addf %130, %132 : vector<1x16xf32>
    %134 = arith.addf %17, %111 : vector<8x16xf32>
    %135 = arith.addf %8, %60 : vector<64x16xf32>
    %136 = arith.addf %25, %133 : vector<1x16xf32>
    %c1 = arith.constant 1 : index
    %c0_89 = arith.constant 0 : index
    %c0_90 = arith.constant 0 : index
    %137 = vector.load %arg3[%c1, %c0_89, %c0_90] : memref<2x384x32xf32, #tpu.memory_space<vmem>>, vector<1x16x32xf32>
    %138 = vector.shape_cast %137 : vector<1x16x32xf32> to vector<16x32xf32>
    %cst_91 = arith.constant dense<0.000000e+00> : vector<8x32xf32>
    %139 = tpu.matmul %134, %138, %cst_91 {dimension_numbers = #tpu.dot_dimension_numbers<[1], [0], [0], [1], [0, 0, 1, 1], [], []>} : vector<8x16xf32>, vector<16x32xf32>, vector<8x32xf32> -> vector<8x32xf32>
    %c1_92 = arith.constant 1 : index
    %c48_93 = arith.constant 48 : index
    %c0_94 = arith.constant 0 : index
    %140 = vector.load %arg3[%c1_92, %c48_93, %c0_94] : memref<2x384x32xf32, #tpu.memory_space<vmem>>, vector<1x16x32xf32>
    %141 = vector.shape_cast %140 : vector<1x16x32xf32> to vector<16x32xf32>
    %cst_95 = arith.constant dense<0.000000e+00> : vector<1x32xf32>
    %142 = tpu.matmul %136, %141, %cst_95 {dimension_numbers = #tpu.dot_dimension_numbers<[1], [0], [0], [1], [0, 0, 1, 1], [], []>} : vector<1x16xf32>, vector<16x32xf32>, vector<1x32xf32> -> vector<1x32xf32>
    %143 = vector.broadcast %142 : vector<1x32xf32> to vector<8x32xf32>
    %144 = arith.addf %139, %143 : vector<8x32xf32>
    %c1_96 = arith.constant 1 : index
    %c64_97 = arith.constant 64 : index
    %c0_98 = arith.constant 0 : index
    %145 = vector.load %arg3[%c1_96, %c64_97, %c0_98] : memref<2x384x32xf32, #tpu.memory_space<vmem>>, vector<1x1x32xf32>
    %146 = vector.shape_cast %145 : vector<1x1x32xf32> to vector<1x32xf32>
    %147 = vector.broadcast %146 : vector<1x32xf32> to vector<8x32xf32>
    %148 = arith.addf %144, %147 : vector<8x32xf32>
    %c1_99 = arith.constant 1 : index
    %c16_100 = arith.constant 16 : index
    %c0_101 = arith.constant 0 : index
    %149 = vector.load %arg3[%c1_99, %c16_100, %c0_101] : memref<2x384x32xf32, #tpu.memory_space<vmem>>, vector<1x16x32xf32>
    %150 = vector.shape_cast %149 : vector<1x16x32xf32> to vector<16x32xf32>
    %cst_102 = arith.constant dense<0.000000e+00> : vector<8x32xf32>
    %151 = tpu.matmul %134, %150, %cst_102 {dimension_numbers = #tpu.dot_dimension_numbers<[1], [0], [0], [1], [0, 0, 1, 1], [], []>} : vector<8x16xf32>, vector<16x32xf32>, vector<8x32xf32> -> vector<8x32xf32>
    %c1_103 = arith.constant 1 : index
    %c32_104 = arith.constant 32 : index
    %c0_105 = arith.constant 0 : index
    %152 = vector.load %arg3[%c1_103, %c32_104, %c0_105] : memref<2x384x32xf32, #tpu.memory_space<vmem>>, vector<1x16x32xf32>
    %153 = vector.shape_cast %152 : vector<1x16x32xf32> to vector<16x32xf32>
    %cst_106 = arith.constant dense<0.000000e+00> : vector<64x32xf32>
    %154 = tpu.matmul %135, %153, %cst_106 {dimension_numbers = #tpu.dot_dimension_numbers<[1], [0], [0], [1], [0, 0, 1, 1], [], []>} : vector<64x16xf32>, vector<16x32xf32>, vector<64x32xf32> -> vector<64x32xf32>
    %155 = vector.shape_cast %154 : vector<64x32xf32> to vector<8x8x32xf32>
    %156 = vector.shape_cast %148 : vector<8x32xf32> to vector<8x1x32xf32>
    %157 = vector.broadcast %156 : vector<8x1x32xf32> to vector<8x8x32xf32>
    %158 = arith.addf %155, %157 : vector<8x8x32xf32>
    %159 = vector.shape_cast %151 : vector<8x32xf32> to vector<1x8x32xf32>
    %160 = vector.broadcast %159 : vector<1x8x32xf32> to vector<8x8x32xf32>
    %161 = arith.addf %158, %160 : vector<8x8x32xf32>
    %cst_107 = arith.constant 0.000000e+00 : f32
    %162 = vector.broadcast %cst_107 : f32 to vector<8x8x32xf32>
    %163 = arith.maximumf %161, %162 : vector<8x8x32xf32>
    %164 = vector.shape_cast %163 : vector<8x8x32xf32> to vector<64x32xf32>
    %c1_108 = arith.constant 1 : index
    %c72_109 = arith.constant 72 : index
    %c0_110 = arith.constant 0 : index
    %165 = vector.load %arg3[%c1_108, %c72_109, %c0_110] : memref<2x384x32xf32, #tpu.memory_space<vmem>>, vector<1x32x16xf32>
    %166 = vector.shape_cast %165 : vector<1x32x16xf32> to vector<32x16xf32>
    %cst_111 = arith.constant dense<0.000000e+00> : vector<64x16xf32>
    %167 = tpu.matmul %164, %166, %cst_111 {dimension_numbers = #tpu.dot_dimension_numbers<[1], [0], [0], [1], [0, 0, 1, 1], [], []>} : vector<64x32xf32>, vector<32x16xf32>, vector<64x16xf32> -> vector<64x16xf32>
    %c1_112 = arith.constant 1 : index
    %c104_113 = arith.constant 104 : index
    %c0_114 = arith.constant 0 : index
    %168 = vector.load %arg3[%c1_112, %c104_113, %c0_114] : memref<2x384x32xf32, #tpu.memory_space<vmem>>, vector<1x1x16xf32>
    %169 = vector.shape_cast %168 : vector<1x1x16xf32> to vector<1x16xf32>
    %170 = vector.broadcast %169 : vector<1x16xf32> to vector<64x16xf32>
    %171 = arith.addf %167, %170 : vector<64x16xf32>
    %c1_115 = arith.constant 1 : index
    %c112_116 = arith.constant 112 : index
    %c0_117 = arith.constant 0 : index
    %172 = vector.load %arg3[%c1_115, %c112_116, %c0_117] : memref<2x384x32xf32, #tpu.memory_space<vmem>>, vector<1x16x32xf32>
    %173 = vector.shape_cast %172 : vector<1x16x32xf32> to vector<16x32xf32>
    %cst_118 = arith.constant dense<0.000000e+00> : vector<8x32xf32>
    %174 = tpu.matmul %134, %173, %cst_118 {dimension_numbers = #tpu.dot_dimension_numbers<[1], [0], [0], [1], [0, 0, 1, 1], [], []>} : vector<8x16xf32>, vector<16x32xf32>, vector<8x32xf32> -> vector<8x32xf32>
    %c1_119 = arith.constant 1 : index
    %c144_120 = arith.constant 144 : index
    %c0_121 = arith.constant 0 : index
    %175 = vector.load %arg3[%c1_119, %c144_120, %c0_121] : memref<2x384x32xf32, #tpu.memory_space<vmem>>, vector<1x1x32xf32>
    %176 = vector.shape_cast %175 : vector<1x1x32xf32> to vector<1x32xf32>
    %177 = vector.broadcast %176 : vector<1x32xf32> to vector<8x32xf32>
    %178 = arith.addf %174, %177 : vector<8x32xf32>
    %c1_122 = arith.constant 1 : index
    %c128_123 = arith.constant 128 : index
    %c0_124 = arith.constant 0 : index
    %179 = vector.load %arg3[%c1_122, %c128_123, %c0_124] : memref<2x384x32xf32, #tpu.memory_space<vmem>>, vector<1x16x32xf32>
    %180 = vector.shape_cast %179 : vector<1x16x32xf32> to vector<16x32xf32>
    %cst_125 = arith.constant dense<0.000000e+00> : vector<64x32xf32>
    %181 = tpu.matmul %171, %180, %cst_125 {dimension_numbers = #tpu.dot_dimension_numbers<[1], [0], [0], [1], [0, 0, 1, 1], [], []>} : vector<64x16xf32>, vector<16x32xf32>, vector<64x32xf32> -> vector<64x32xf32>
    %182 = vector.shape_cast %181 : vector<64x32xf32> to vector<8x8x32xf32>
    %183 = vector.shape_cast %178 : vector<8x32xf32> to vector<8x1x32xf32>
    %184 = vector.broadcast %183 : vector<8x1x32xf32> to vector<8x8x32xf32>
    %185 = arith.addf %182, %184 : vector<8x8x32xf32>
    %cst_126 = arith.constant 0.000000e+00 : f32
    %186 = vector.broadcast %cst_126 : f32 to vector<8x8x32xf32>
    %187 = arith.maximumf %185, %186 : vector<8x8x32xf32>
    %cst_127 = arith.constant dense<0.000000e+00> : vector<8x32xf32>
    %188 = vector.multi_reduction <add>, %187, %cst_127 [0] : vector<8x8x32xf32> to vector<8x32xf32>
    %cst_128 = arith.constant 1.250000e-01 : f32
    %189 = vector.broadcast %cst_128 : f32 to vector<8x32xf32>
    %190 = arith.mulf %188, %189 : vector<8x32xf32>
    %c1_129 = arith.constant 1 : index
    %c152_130 = arith.constant 152 : index
    %c0_131 = arith.constant 0 : index
    %191 = vector.load %arg3[%c1_129, %c152_130, %c0_131] : memref<2x384x32xf32, #tpu.memory_space<vmem>>, vector<1x32x32xf32>
    %192 = vector.shape_cast %191 : vector<1x32x32xf32> to vector<32x32xf32>
    %cst_132 = arith.constant dense<0.000000e+00> : vector<8x32xf32>
    %193 = tpu.matmul %190, %192, %cst_132 {dimension_numbers = #tpu.dot_dimension_numbers<[1], [0], [0], [1], [0, 0, 1, 1], [], []>} : vector<8x32xf32>, vector<32x32xf32>, vector<8x32xf32> -> vector<8x32xf32>
    %c1_133 = arith.constant 1 : index
    %c184_134 = arith.constant 184 : index
    %c0_135 = arith.constant 0 : index
    %194 = vector.load %arg3[%c1_133, %c184_134, %c0_135] : memref<2x384x32xf32, #tpu.memory_space<vmem>>, vector<1x1x32xf32>
    %195 = vector.shape_cast %194 : vector<1x1x32xf32> to vector<1x32xf32>
    %196 = vector.broadcast %195 : vector<1x32xf32> to vector<8x32xf32>
    %197 = arith.addf %193, %196 : vector<8x32xf32>
    %c1_136 = arith.constant 1 : index
    %c192_137 = arith.constant 192 : index
    %c0_138 = arith.constant 0 : index
    %198 = vector.load %arg3[%c1_136, %c192_137, %c0_138] : memref<2x384x32xf32, #tpu.memory_space<vmem>>, vector<1x16x32xf32>
    %199 = vector.shape_cast %198 : vector<1x16x32xf32> to vector<16x32xf32>
    %cst_139 = arith.constant dense<0.000000e+00> : vector<8x32xf32>
    %200 = tpu.matmul %134, %199, %cst_139 {dimension_numbers = #tpu.dot_dimension_numbers<[1], [0], [0], [1], [0, 0, 1, 1], [], []>} : vector<8x16xf32>, vector<16x32xf32>, vector<8x32xf32> -> vector<8x32xf32>
    %c1_140 = arith.constant 1 : index
    %c208_141 = arith.constant 208 : index
    %c0_142 = arith.constant 0 : index
    %201 = vector.load %arg3[%c1_140, %c208_141, %c0_142] : memref<2x384x32xf32, #tpu.memory_space<vmem>>, vector<1x32x32xf32>
    %202 = vector.shape_cast %201 : vector<1x32x32xf32> to vector<32x32xf32>
    %cst_143 = arith.constant dense<0.000000e+00> : vector<8x32xf32>
    %203 = tpu.matmul %197, %202, %cst_143 {dimension_numbers = #tpu.dot_dimension_numbers<[1], [0], [0], [1], [0, 0, 1, 1], [], []>} : vector<8x32xf32>, vector<32x32xf32>, vector<8x32xf32> -> vector<8x32xf32>
    %204 = arith.addf %200, %203 : vector<8x32xf32>
    %c1_144 = arith.constant 1 : index
    %c240_145 = arith.constant 240 : index
    %c0_146 = arith.constant 0 : index
    %205 = vector.load %arg3[%c1_144, %c240_145, %c0_146] : memref<2x384x32xf32, #tpu.memory_space<vmem>>, vector<1x16x32xf32>
    %206 = vector.shape_cast %205 : vector<1x16x32xf32> to vector<16x32xf32>
    %cst_147 = arith.constant dense<0.000000e+00> : vector<1x32xf32>
    %207 = tpu.matmul %136, %206, %cst_147 {dimension_numbers = #tpu.dot_dimension_numbers<[1], [0], [0], [1], [0, 0, 1, 1], [], []>} : vector<1x16xf32>, vector<16x32xf32>, vector<1x32xf32> -> vector<1x32xf32>
    %208 = vector.broadcast %207 : vector<1x32xf32> to vector<8x32xf32>
    %209 = arith.addf %204, %208 : vector<8x32xf32>
    %c1_148 = arith.constant 1 : index
    %c256_149 = arith.constant 256 : index
    %c0_150 = arith.constant 0 : index
    %210 = vector.load %arg3[%c1_148, %c256_149, %c0_150] : memref<2x384x32xf32, #tpu.memory_space<vmem>>, vector<1x1x32xf32>
    %211 = vector.shape_cast %210 : vector<1x1x32xf32> to vector<1x32xf32>
    %212 = vector.broadcast %211 : vector<1x32xf32> to vector<8x32xf32>
    %213 = arith.addf %209, %212 : vector<8x32xf32>
    %cst_151 = arith.constant 0.000000e+00 : f32
    %214 = vector.broadcast %cst_151 : f32 to vector<8x32xf32>
    %215 = arith.maximumf %213, %214 : vector<8x32xf32>
    %c1_152 = arith.constant 1 : index
    %c264_153 = arith.constant 264 : index
    %c0_154 = arith.constant 0 : index
    %216 = vector.load %arg3[%c1_152, %c264_153, %c0_154] : memref<2x384x32xf32, #tpu.memory_space<vmem>>, vector<1x32x16xf32>
    %217 = vector.shape_cast %216 : vector<1x32x16xf32> to vector<32x16xf32>
    %cst_155 = arith.constant dense<0.000000e+00> : vector<8x16xf32>
    %218 = tpu.matmul %215, %217, %cst_155 {dimension_numbers = #tpu.dot_dimension_numbers<[1], [0], [0], [1], [0, 0, 1, 1], [], []>} : vector<8x32xf32>, vector<32x16xf32>, vector<8x16xf32> -> vector<8x16xf32>
    %c1_156 = arith.constant 1 : index
    %c296_157 = arith.constant 296 : index
    %c0_158 = arith.constant 0 : index
    %219 = vector.load %arg3[%c1_156, %c296_157, %c0_158] : memref<2x384x32xf32, #tpu.memory_space<vmem>>, vector<1x1x16xf32>
    %220 = vector.shape_cast %219 : vector<1x1x16xf32> to vector<1x16xf32>
    %221 = vector.broadcast %220 : vector<1x16xf32> to vector<8x16xf32>
    %222 = arith.addf %218, %221 : vector<8x16xf32>
    %cst_159 = arith.constant dense<0.000000e+00> : vector<16xf32>
    %223 = vector.multi_reduction <add>, %222, %cst_159 [0] : vector<8x16xf32> to vector<16xf32>
    %224 = vector.shape_cast %223 : vector<16xf32> to vector<1x16xf32>
    %cst_160 = arith.constant 1.250000e-01 : f32
    %225 = vector.broadcast %cst_160 : f32 to vector<1x16xf32>
    %226 = arith.mulf %224, %225 : vector<1x16xf32>
    %c1_161 = arith.constant 1 : index
    %c304_162 = arith.constant 304 : index
    %c0_163 = arith.constant 0 : index
    %227 = vector.load %arg3[%c1_161, %c304_162, %c0_163] : memref<2x384x32xf32, #tpu.memory_space<vmem>>, vector<1x16x32xf32>
    %228 = vector.shape_cast %227 : vector<1x16x32xf32> to vector<16x32xf32>
    %cst_164 = arith.constant dense<0.000000e+00> : vector<1x32xf32>
    %229 = tpu.matmul %136, %228, %cst_164 {dimension_numbers = #tpu.dot_dimension_numbers<[1], [0], [0], [1], [0, 0, 1, 1], [], []>} : vector<1x16xf32>, vector<16x32xf32>, vector<1x32xf32> -> vector<1x32xf32>
    %c1_165 = arith.constant 1 : index
    %c320_166 = arith.constant 320 : index
    %c0_167 = arith.constant 0 : index
    %230 = vector.load %arg3[%c1_165, %c320_166, %c0_167] : memref<2x384x32xf32, #tpu.memory_space<vmem>>, vector<1x16x32xf32>
    %231 = vector.shape_cast %230 : vector<1x16x32xf32> to vector<16x32xf32>
    %cst_168 = arith.constant dense<0.000000e+00> : vector<1x32xf32>
    %232 = tpu.matmul %226, %231, %cst_168 {dimension_numbers = #tpu.dot_dimension_numbers<[1], [0], [0], [1], [0, 0, 1, 1], [], []>} : vector<1x16xf32>, vector<16x32xf32>, vector<1x32xf32> -> vector<1x32xf32>
    %233 = arith.addf %229, %232 : vector<1x32xf32>
    %c1_169 = arith.constant 1 : index
    %c336_170 = arith.constant 336 : index
    %c0_171 = arith.constant 0 : index
    %234 = vector.load %arg3[%c1_169, %c336_170, %c0_171] : memref<2x384x32xf32, #tpu.memory_space<vmem>>, vector<1x1x32xf32>
    %235 = vector.shape_cast %234 : vector<1x1x32xf32> to vector<1x32xf32>
    %236 = arith.addf %233, %235 : vector<1x32xf32>
    %cst_172 = arith.constant 0.000000e+00 : f32
    %237 = vector.broadcast %cst_172 : f32 to vector<1x32xf32>
    %238 = arith.maximumf %236, %237 : vector<1x32xf32>
    %c1_173 = arith.constant 1 : index
    %c344_174 = arith.constant 344 : index
    %c0_175 = arith.constant 0 : index
    %239 = vector.load %arg3[%c1_173, %c344_174, %c0_175] : memref<2x384x32xf32, #tpu.memory_space<vmem>>, vector<1x32x16xf32>
    %240 = vector.shape_cast %239 : vector<1x32x16xf32> to vector<32x16xf32>
    %cst_176 = arith.constant dense<0.000000e+00> : vector<1x16xf32>
    %241 = tpu.matmul %238, %240, %cst_176 {dimension_numbers = #tpu.dot_dimension_numbers<[1], [0], [0], [1], [0, 0, 1, 1], [], []>} : vector<1x32xf32>, vector<32x16xf32>, vector<1x16xf32> -> vector<1x16xf32>
    %c1_177 = arith.constant 1 : index
    %c376_178 = arith.constant 376 : index
    %c0_179 = arith.constant 0 : index
    %242 = vector.load %arg3[%c1_177, %c376_178, %c0_179] : memref<2x384x32xf32, #tpu.memory_space<vmem>>, vector<1x1x16xf32>
    %243 = vector.shape_cast %242 : vector<1x1x16xf32> to vector<1x16xf32>
    %244 = arith.addf %241, %243 : vector<1x16xf32>
    %245 = arith.addf %134, %222 : vector<8x16xf32>
    %246 = arith.addf %136, %244 : vector<1x16xf32>
    %c48_180 = arith.constant 48 : index
    %c0_181 = arith.constant 0 : index
    %247 = vector.load %arg4[%c48_180, %c0_181] : memref<120x16xf32, #tpu.memory_space<vmem>>, vector<16x1xf32>
    %cst_182 = arith.constant dense<0.000000e+00> : vector<8x1xf32>
    %248 = tpu.matmul %245, %247, %cst_182 {dimension_numbers = #tpu.dot_dimension_numbers<[1], [0], [0], [1], [0, 0, 1, 1], [], []>} : vector<8x16xf32>, vector<16x1xf32>, vector<8x1xf32> -> vector<8x1xf32>
    %c64_183 = arith.constant 64 : index
    %c0_184 = arith.constant 0 : index
    %249 = vector.load %arg4[%c64_183, %c0_184] : memref<120x16xf32, #tpu.memory_space<vmem>>, vector<1x1xf32>
    %250 = vector.broadcast %249 : vector<1x1xf32> to vector<8x1xf32>
    %251 = arith.addf %248, %250 : vector<8x1xf32>
    %c0_185 = arith.constant 0 : index
    %c0_186 = arith.constant 0 : index
    %252 = vector.load %arg5[%c0_185, %c0_186] : memref<8x1xf32, #tpu.memory_space<vmem>>, vector<8x1xf32>
    tpu.vector_store %arg5[%c0_185, %c0_186], %251 {strides = array<i32>} : memref<8x1xf32, #tpu.memory_space<vmem>>, vector<8x1xf32>,
    %c72_187 = arith.constant 72 : index
    %c0_188 = arith.constant 0 : index
    %253 = vector.load %arg4[%c72_187, %c0_188] : memref<120x16xf32, #tpu.memory_space<vmem>>, vector<16x16xf32>
    %cst_189 = arith.constant dense<0.000000e+00> : vector<1x16xf32>
    %254 = tpu.matmul %246, %253, %cst_189 {dimension_numbers = #tpu.dot_dimension_numbers<[1], [0], [0], [1], [0, 0, 1, 1], [], []>} : vector<1x16xf32>, vector<16x16xf32>, vector<1x16xf32> -> vector<1x16xf32>
    %c88 = arith.constant 88 : index
    %c0_190 = arith.constant 0 : index
    %255 = vector.load %arg4[%c88, %c0_190] : memref<120x16xf32, #tpu.memory_space<vmem>>, vector<1x16xf32>
    %256 = arith.addf %254, %255 : vector<1x16xf32>
    %cst_191 = arith.constant 0.00999999977 : f32
    %257 = vector.broadcast %cst_191 : f32 to vector<1x16xf32>
    %258 = arith.mulf %257, %256 : vector<1x16xf32>
    %259 = arith.maximumf %256, %258 : vector<1x16xf32>
    %c96 = arith.constant 96 : index
    %c0_192 = arith.constant 0 : index
    %260 = vector.load %arg4[%c96, %c0_192] : memref<120x16xf32, #tpu.memory_space<vmem>>, vector<16x1xf32>
    %cst_193 = arith.constant dense<0.000000e+00> : vector<1x1xf32>
    %261 = tpu.matmul %259, %260, %cst_193 {dimension_numbers = #tpu.dot_dimension_numbers<[1], [0], [0], [1], [0, 0, 1, 1], [], []>} : vector<1x16xf32>, vector<16x1xf32>, vector<1x1xf32> -> vector<1x1xf32>
    %c112_194 = arith.constant 112 : index
    %c0_195 = arith.constant 0 : index
    %262 = vector.load %arg4[%c112_194, %c0_195] : memref<120x16xf32, #tpu.memory_space<vmem>>, vector<1x1xf32>
    %263 = arith.addf %261, %262 : vector<1x1xf32>
    %c0_196 = arith.constant 0 : index
    %c0_197 = arith.constant 0 : index
    %264 = vector.load %arg6[%c0_196, %c0_197] : memref<1x1xf32, #tpu.memory_space<vmem>>, vector<1x1xf32>
    tpu.vector_store %arg6[%c0_196, %c0_197], %263 {strides = array<i32>} : memref<1x1xf32, #tpu.memory_space<vmem>>, vector<1x1xf32>,
    return
  }
}

</mosaic_0001>

<bundles_post_ra>
// kernel: forward.1
= control target key start
LH: loop header
LB: loop body
LE: loop exit
PB: predicated region body
PF: predicated region fallthrough
CT: control target
= control target key end

     0   :  { %vm194_vm0 = vcmask 64512   ;;  %v4617_v2 = vmov 0.0   ;;  %vm4618_vm1 = vmmov 0   ;;  %vm62_vm2 = vcmask 1043456   ;;  %s5415_s0 = inlined_call_operand.vmem [shape: f32[8,8], index: 0, kind: input, shape index: {}]   ;;  %s5416_s1 = inlined_call_operand.vmem [shape: f32[64,4], index: 1, kind: input, shape index: {}]   ;;  %s5417_s2 = inlined_call_operand.vmem [shape: f32[1,4], index: 2, kind: input, shape index: {}]   ;;  %s5418_s3 = inlined_call_operand.vmem [shape: f32[2,384,32], index: 3, kind: input, shape index: {}]   ;;  %s5419_s4 = inlined_call_operand.vmem [shape: f32[120,16], index: 4, kind: input, shape index: {}]   ;;  %s5420_s5 = inlined_call_operand.vmem [shape: f32[8,1], index: 5, kind: output, shape index: {0}]   ;;  %s5421_s6 = inlined_call_operand.hbm [shape: f32[1,1], index: 6, kind: output, shape index: {1}]  }
   0x1   :  { %v188_v0 = vld [vmem:[%s5419_s4 + $0x10] sm:$0xff]  ;;  %v187_v1 = vld [vmem:[%s5415_s0] sm:$0xff]  ;;  %4116 = vmatprep.subr.mxu1 %v4617_v2  ;;  %4118 = vmatprep.mubr.msk.f32.mxu1 %vm4618_vm1, %v4617_v2  ;;  %vm37_vm3 = vcmask 31744   ;;  %v24_v7 = vld [vmem:[%s5416_s1 + $0x8] sm:$0xff] }
   0x2   :  { %v271_v3 = vld [vmem:[%s5419_s4 + $0x20] sm:$0xf]  ;;  %4117 = vmatpush3.msra.mxu1 %v188_v0  ;;  %v25_v8 = vld [vmem:[%s5416_s1 + $0x10] sm:$0xff] }
   0x3   :  { %v23_v4 = vld [vmem:[%s5416_s1] sm:$0xff]  ;;  %4119 = vmatmul.mubr.msk.f32.vlgmr.msra.gmra.mrb[0].mxu1 %vm194_vm0, %v187_v1  ;;  %4121 = vmatprep.subr.mxu1 %v4617_v2 }
   0x4   :  { %v31_v5 = vld [vmem:[%s5419_s4] sm:$0xf]  ;;  %4104 = vmatprep.mubr.msk.f32.mxu0 %vm37_vm3, %v23_v4  ;;  %4122 = vmatpush3.msk.msra.mxu1 %vm62_vm2, %v271_v3 }
   0x5   :  { %4123 = vmatprep.mubr.msk.f32.mxu1 %vm4618_vm1, %v4617_v2  ;;  %v270_v6 = vld [vmem:[%s5417_s2] sm:$0x1]  ;;  %4102 = vmatprep.subr.msk.mxu0 %vm62_vm2, %v31_v5 }
   0x6   :  { %12 = vsyncpa [#allocation3], 0  ;;  %4103 = vmatpush3.msk.msra.mxu0 %vm62_vm2, %v31_v5  ;;  %v26_v9 = vld [vmem:[%s5416_s1 + $0x18] sm:$0xff]  ;;  %v27_v10 = vld [vmem:[%s5416_s1 + $0x20] sm:$0xff]  ;;  %v4619_v17 = vmov 0.0|0.0   ;;  %vm355_vm4 = vcmask 130048  }
   0x7   :  { %4124 = vmatmul.mubr.msk.f32.vlgmr.msra.gmra.mrb[2].mxu1 %vm37_vm3, %v270_v6  ;;  %4105 = vmatmul.mubr.msk.f32.vlgmr.msra.gmra.mrb[0].mxu0 %vm37_vm3, %v24_v7  ;;  %v28_v11 = vld [vmem:[%s5416_s1 + $0x28] sm:$0xff]  ;;  %v29_v12 = vld [vmem:[%s5416_s1 + $0x30] sm:$0xff]  ;;  %v30_v13 = vld [vmem:[%s5416_s1 + $0x38] sm:$0xff]  ;;  %vm838_vm5 = vcmask 261120   ;;  %vm3602_vm6 = vcmask 7168   ;;  %s4621_s21 = smov [#allocation2]  }
   0x8   :  { %4107 = vmatprep.mubr.msk.f32.mxu0 %vm37_vm3, %v25_v8  ;;  %4130 = vmatprep.mubr.msk.f32.mxu1 %vm4618_vm1, %v4617_v2  ;;  %v512_v14 = vld [vmem:[%s5418_s3 + $0x10] sm:$0xff]  ;;  %v513_v15 = vld [vmem:[%s5418_s3 + $0x18] sm:$0xff]  ;;  %v272_v25 = vld [vmem:[%s5419_s4 + $0x28] sm:$0x1]  ;;  %s3768_s22 = sshll.u32 %s4621_s21, 4  ;;  %vm3758_vm7 = vcmask 0   ;;  %s3769_s22 = int_to_ptr.vmem [resolvable:$true] %s3768_s22 }
   0x9   :  { %v4458_v16 = vpack.c.bf16 %v513_v15, %v512_v14  ;;  %4457 = vmatprep.subr.bf16.mxu0 %v4619_v17  ;;  %4451 = vmatprep.subr.bf16.mxu1 %v4619_v17  ;;  %v353_v18 = vld [vmem:[%s5418_s3 + $0x30] sm:$0xff]  ;;  %v354_v19 = vld [vmem:[%s5418_s3 + $0x38] sm:$0xff]  ;;  %v3778_v27 = vld [vmem:[%s5419_s4 + $0x8] ss:$0 sm:$0xff]  ;;  %s4593_s23 = scalar_lea.vmem %s3769_s22, 16  ;;  %s4597_s24 = scalar_lea.vmem %s3769_s22, 32 }
   0xa   :  { %v4452_v20 = vpack.c.bf16 %v354_v19, %v353_v18  ;;  %v3788_v21 = vld [vmem:[%s5419_s4 + $0x18] ss:$0 sm:$0xff]  ;;  %v351_v34 = vld [vmem:[%s5418_s3] sm:$0xff]  ;;  %v352_v35 = vld [vmem:[%s5418_s3 + $0x8] sm:$0xff]  ;;  %v429_v19 = vlaneseq  ;;  %p4594_p0 = scmp.ne.s32.totalorder %s3769_s22, %s4593_s23  ;;  %p4598_p1 = scmp.lt.s32.totalorder %s3769_s22, %s3769_s22 }
   0xb   :  { %4108 = vmatmul.mubr.msk.f32.gmra.mrb[2].mxu0 %vm37_vm3, %v26_v9  ;;  %v584_v37 = vld [vmem:[%s5418_s3 + $0x20] sm:$0xff]  ;;  %v585_v38 = vld [vmem:[%s5418_s3 + $0x28] sm:$0xff]  ;;  %v4455_v42 = vpack.c.bf16 %v352_v35, %v351_v34  ;;  %v968_v54 = vld [vmem:[%s5418_s3 + $0x70] sm:$0xff]  ;;  %p4599_p2 = scmp.lt.s32.totalorder %s4597_s24, %s4593_s23 }
   0xc   :  { %4110 = vmatprep.mubr.msk.f32.mxu0 %vm37_vm3, %v27_v10  ;;  %4459 = vmatpush3.bf16.msra.mxu0 %v4458_v16  ;;  %v4460_v46 = vpack.c.bf16 %v585_v38, %v584_v37  ;;  %v969_v55 = vld [vmem:[%s5418_s3 + $0x78] sm:$0xff]  ;;  %v832_v16 = vld [vmem:[%s5418_s3 + $0x60] sm:$0xff] }
   0xd   :  { %4453 = vmatpush3.bf16.msra.mxu1 %v4452_v20  ;;  %v4473_v63 = vpack.c.bf16 %v969_v55, %v968_v54  ;;  %v831_v15 = vld [vmem:[%s5418_s3 + $0x58] sm:$0xff]  ;;  %v430_v20 = vshrl.u32 %v429_v19, 7  ;;  %p4600_p3 = por %p4599_p2, %p4598_p1 }
   0xe   :  { %4454 = vmatprep.subr.bf16.mxu1 %v4619_v17  ;;  %v4468_v18 = vpack.c.bf16 %v832_v16, %v831_v15 }
   0xf   :  { %4111 = vmatmul.mubr.msk.f32.gmra.mrb[4].mxu0 %vm37_vm3, %v28_v11  ;;  %p4601_p4 = pnand %p4600_p3, %p4594_p0 }
  0x10   :  { %4113 = vmatprep.mubr.msk.f32.mxu0 %vm37_vm3, %v29_v12  ;;  %v829_v12 = vld [vmem:[%s5418_s3 + $0x48] sm:$0xff] }
  0x13   :  { %4114 = vmatmul.mubr.msk.f32.gmra.mrb[6].mxu0 %vm37_vm3, %v30_v13  ;;  %v830_v13 = vld [vmem:[%s5418_s3 + $0x50] sm:$0xff] }
  0x14   :  { %4144 = vmatprep.mubr.msk.f32.mxu0 %vm4618_vm1, %v4617_v2  ;;  %v4464_v14 = vpack.c.bf16 %v830_v13, %v829_v12 }
  0x16   :  { %4465 = vmatprep.subr.bf16.mxu0 %v4464_v14 }
  0xd6   :  { %v264_v22 = vpop.f32.mrb[0].mxu1 }
  0xd7   :  { %v265_v23 = vadd.f32 %v3788_v21, %v264_v22  ;;  %v4120_v24 = vpop.f32.mrb[1].mxu1 }
  0xd9   :  { %v268_v26 = vmul.f32 0.01, %v265_v23 }
  0xda   :  { %v345_v28 = vpop.f32.mrb[2].mxu1  ;;  %v4106_v29 = vpop.f32.mrb[0].mxu0 }
  0xdb   :  { %v4742_v30 = vmax.f32 %v265_v23, %v268_v26  ;;  %v346_v31 = vadd.f32 %v345_v28, %v272_v25  ;;  %v4125_v32 = vpop.f32.mrb[3].mxu1  ;;  %v132_v33 = vpop.f32.mrb[1].mxu0  ;;  %v138_v40 = vadd.f32 %v4106_v29, %v3778_v27  ;;  %v4620_v23 = vmov 1966171168  }
  0xdc   :  { %v133_v36 = vadd.f32 %v3778_v27, %v132_v33  ;;  %v718_v24 = vunpack.c.l.s4 %v4620_v23  ;;  %v4824_v25 = vsub.s32 0, %v430_v20  ;;  %v3794_v32 = vld [vmem:[%s5418_s3 + $0x40] ss:$0 sm:$0xff] }
  0xdd   :  { %v349_v39 = vmul.f32 0.01, %v346_v31  ;;  %4145 = vmatmul.mubr.msk.f32.vlgmr.msra.gmra.mrb[8].mxu0 %vm355_vm4, %v4742_v30  ;;  %v172_v48 = vmul.f32 0.01, %v138_v40 }
  0xde   :  { %v171_v41 = vmul.f32 0.01, %v133_v36  ;;  %v4109_v43 = vpop.f32.mrb[2].mxu0  ;;  %4467 = vmatpush3.bf16.msra.mxu0 %v4464_v14  ;;  %v719_v28 = vunpack.c.0.s8 %v718_v24 }
  0xdf   :  { %v4758_v44 = vmax.f32 %v346_v31, %v349_v39  ;;  %v142_v45 = vpop.f32.mrb[3].mxu0  ;;  %v148_v49 = vadd.f32 %v4109_v43, %v3778_v27  ;;  %v4772_v57 = vmax.f32 %v138_v40, %v172_v48  ;;  %4469 = vmatprep.subr.bf16.mxu0 %v4468_v18 }
  0xe0   :  { %v143_v47 = vadd.f32 %v3778_v27, %v142_v45  ;;  %v4762_v50 = vmax.f32 %v133_v36, %v171_v41  ;;  %v4830_v34 = vsub.s32 %v719_v28, %v430_v20 }
  0xe1   :  { %4131 = vmatmul.mubr.msk.f32.vlgmr.msra.gmra.mrb[4].mxu1 %vm355_vm4, %v4758_v44  ;;  %v174_v58 = vmul.f32 0.01, %v148_v49 }
  0xe2   :  { %4456 = vmatpush3.bf16.msra.mxu1 %v4455_v42  ;;  %4137 = vmatprep.mubr.msk.f32.mxu1 %vm4618_vm1, %v4617_v2  ;;  %v173_v51 = vmul.f32 0.01, %v143_v47  ;;  %v4112_v52 = vpop.f32.mrb[4].mxu0 }
  0xe3   :  { %4461 = vmatprep.subr.bf16.mxu1 %v4460_v46  ;;  %v152_v53 = vpop.f32.mrb[5].mxu0  ;;  %v158_v59 = vadd.f32 %v4112_v52, %v3778_v27  ;;  %v4781_v3 = vmax.f32 %v148_v49, %v174_v58  ;;  %4471 = vmatpush3.bf16.msra.mxu0 %v4468_v18 }
  0xe4   :  { %v153_v56 = vadd.f32 %v3778_v27, %v152_v53  ;;  %v4776_v60 = vmax.f32 %v143_v47, %v173_v51  ;;  %4479 = vmatprep.subr.bf16.mxu0 %v4619_v17 }
  0xe5   :  { %4138 = vmatmul.mubr.msk.f32.vlgmr.msra.gmra.mrb[6].mxu1 %vm355_vm4, %v4742_v30  ;;  %v176_v4 = vmul.f32 0.01, %v158_v59 }
  0xe6   :  { %4463 = vmatpush3.bf16.msra.mxu1 %v4460_v46  ;;  %4151 = vmatprep.mubr.msk.f32.mxu1 %vm355_vm4, %v4762_v50  ;;  %v175_v61 = vmul.f32 0.01, %v153_v56  ;;  %v4115_v62 = vpop.f32.mrb[6].mxu0 }
  0xe7   :  { %v162_v0 = vpop.f32.mrb[7].mxu0  ;;  %4472 = vmatprep.subr.bf16.mxu1 %v4619_v17  ;;  %v168_v5 = vadd.f32 %v4115_v62, %v3778_v27  ;;  %v4789_v8 = vmax.f32 %v158_v59, %v176_v4 }
  0xe8   :  { %v163_v1 = vadd.f32 %v3778_v27, %v162_v0  ;;  %v4785_v6 = vmax.f32 %v153_v56, %v175_v61 }
  0xe9   :  { %4152 = vmatmul.mubr.msk.f32.vlgmr.msra.gmra.mrb[8].mxu1 %vm355_vm4, %v4772_v57  ;;  %v178_v9 = vmul.f32 0.01, %v168_v5 }
  0xea   :  { %4154 = vmatprep.mubr.msk.f32.mxu1 %vm355_vm4, %v4776_v60  ;;  %v177_v7 = vmul.f32 0.01, %v163_v1  ;;  %4474 = vmatpush3.bf16.msra.mxu1 %v4473_v63 }
  0xeb   :  { %v4797_v11 = vmax.f32 %v168_v5, %v178_v9 }
  0xec   :  { %v4793_v10 = vmax.f32 %v163_v1, %v177_v7 }
  0xed   :  { %4155 = vmatmul.mubr.msk.f32.gmra.mrb[10].mxu1 %vm355_vm4, %v4781_v3 }
  0xee   :  { %4157 = vmatprep.mubr.msk.f32.mxu1 %vm355_vm4, %v4785_v6 }
  0xf1   :  { %4158 = vmatmul.mubr.msk.f32.gmra.mrb[12].mxu1 %vm355_vm4, %v4789_v8 }
  0xf2   :  { %4160 = vmatprep.mubr.msk.f32.mxu1 %vm355_vm4, %v4793_v10 }
  0xf5   :  { %4161 = vmatmul.mubr.msk.f32.gmra.mrb[14].mxu1 %vm355_vm4, %v4797_v11 }
  0xf6   :  { %4187 = vmatprep.mubr.msk.f32.mxu1 %vm4618_vm1, %v4617_v2 }
  0xf9   :  { %4188 = vmatmul.mubr.msk.f32.vlgmr.msra.gmra.mrb[16].mxu1 %vm355_vm4, %v4742_v30 }
 0x1b0   :  { %v4822_v21 = vpop.f32.mrb[8].mxu0 }
 0x1b1   :  { %v4146_v22 = vpop.f32.mrb[9].mxu0 }
 0x1b4   :  { %v425_v26 = vpop.f32.mrb[4].mxu1 }
 0x1b5   :  { %v4132_v27 = vpop.f32.mrb[5].mxu1  ;;  %v432_v29 = vrot.slane %v425_v26, %v4824_v25 }
 0x1b8   :  { %v502_v31 = vpop.f32.mrb[6].mxu1 }
 0x1b9   :  { %v503_v33 = vadd.f32 %v502_v31, %v432_v29  ;;  %v4139_v35 = vpop.f32.mrb[7].mxu1 }
 0x1bb   :  { %v511_v36 = vadd.f32 %v3794_v32, %v503_v33 }
 0x1bc   :  { %v4153_v37 = vpop.f32.mrb[8].mxu1 }
 0x1bd   :  { %v716_v38 = vcombine.high %v511_v36, %v511_v36  ;;  %v723_v39 = vrot.slane %v511_v36, %v4830_v34  ;;  %v676_v40 = vpop.f32.mrb[9].mxu1 }
 0x1bf   :  { %v730_v41 = vrot.slane %v716_v38, %v4830_v34  ;;  %v731_v42 = vcombine.high %v723_v39, %v723_v39  ;;  %v739_v43 = vrot.slane %v723_v39, %v4830_v34 }
 0x1c0   :  { %v4156_v45 = vpop.f32.mrb[10].mxu1 }
 0x1c1   :  { %v753_v46 = vrot.slane %v731_v42, %v4830_v34  ;;  %v768_v47 = vrot.slane %v739_v43, %v4824_v25  ;;  %v686_v48 = vpop.f32.mrb[11].mxu1  ;;  %v761_v49 = vcombine.high %v739_v43, %v739_v43  ;;  %v732_v51 = vcombine.high %v730_v41, %v730_v41  ;;  %v1046_v43 = vld [vmem:[%s5418_s3 + $0x88] sm:$0xff] }
 0x1c2   :  { %v746_v52 = vrot.slane %v730_v41, %v4830_v34 }
 0x1c3   :  { %v772_v53 = vrot.slane %v753_v46, %v4824_v25  ;;  %v805_v54 = vadd.f32 %v768_v47, %v676_v40  ;;  %v763_v55 = vcombine.high %v753_v46, %v753_v46  ;;  %v776_v56 = vrot.slane %v761_v49, %v4824_v25  ;;  %v3804_v46 = vld [vmem:[%s5418_s3 + $0x68] ss:$0 sm:$0xff]  ;;  %v1529_v47 = vld [vmem:[%s5418_s3 + $0xf0] sm:$0xff] }
 0x1c4   :  { %v4159_v58 = vpop.f32.mrb[12].mxu1  ;;  %v760_v59 = vrot.slane %v732_v51, %v4830_v34  ;;  %v784_v61 = vrot.slane %v746_v52, %v4824_v25  ;;  %v762_v62 = vcombine.high %v746_v52, %v746_v52 }
 0x1c5   :  { %v806_v63 = vadd.f32 %v4153_v37, %v772_v53  ;;  %v813_v0 = vadd.f32 %v805_v54, %v4822_v21  ;;  %v780_v1 = vrot.slane %v763_v55, %v4824_v25  ;;  %v807_v4 = vadd.f32 %v776_v56, %v686_v48  ;;  %v696_v5 = vpop.f32.mrb[13].mxu1  ;;  %v1530_v48 = vld [vmem:[%s5418_s3 + $0xf8] sm:$0xff] }
 0x1c6   :  { %v788_v7 = vrot.slane %v760_v59, %v4824_v25  ;;  %v809_v9 = vadd.f32 %v784_v61, %v696_v5  ;;  %v764_v12 = vcombine.high %v760_v59, %v760_v59  ;;  %v792_v23 = vrot.slane %v762_v62, %v4824_v25 }
 0x1c7   :  { %v814_v13 = vadd.f32 %v806_v63, %v4822_v21  ;;  %v821_v14 = vmax.f32 %v813_v0, 0.0  ;;  %v808_v15 = vadd.f32 %v4156_v45, %v780_v1  ;;  %v815_v16 = vadd.f32 %v807_v4, %v4822_v21 }
 0x1c8   :  { %v810_v18 = vadd.f32 %v4159_v58, %v788_v7  ;;  %v817_v19 = vadd.f32 %v809_v9, %v4822_v21  ;;  %v4162_v20 = vpop.f32.mrb[14].mxu1  ;;  %v796_v22 = vrot.slane %v764_v12, %v4824_v25  ;;  %v4495_v53 = vpack.c.bf16 %v1530_v48, %v1529_v47  ;;  %v1298_v9 = vld [vmem:[%s5418_s3 + $0x98] sm:$0xff]  ;;  %v1299_v12 = vld [vmem:[%s5418_s3 + $0xa0] sm:$0xff] }
 0x1c9   :  { %v822_v24 = vmax.f32 %v814_v13, 0.0  ;;  %v816_v26 = vadd.f32 %v808_v15, %v4822_v21  ;;  %v823_v27 = vmax.f32 %v815_v16, 0.0  ;;  %v706_v28 = vpop.f32.mrb[15].mxu1  ;;  %4171 = vmatprep.mubr.msk.f32.mxu0 %vm838_vm5, %v821_v14  ;;  %v4480_v13 = vpack.c.bf16 %v1299_v12, %v1298_v9  ;;  %v1300_v14 = vld [vmem:[%s5418_s3 + $0xa8] sm:$0xff]  ;;  %v1301_v15 = vld [vmem:[%s5418_s3 + $0xb0] sm:$0xff] }
 0x1ca   :  { %v818_v29 = vadd.f32 %v810_v18, %v4822_v21  ;;  %v812_v31 = vadd.f32 %v4162_v20, %v796_v22  ;;  %v811_v32 = vadd.f32 %v792_v23, %v706_v28  ;;  %v825_v39 = vmax.f32 %v817_v19, 0.0  ;;  %v3813_v18 = vld [vmem:[%s5418_s3 + $0x90] ss:$0 sm:$0xff] }
 0x1cb   :  { %4172 = vmatmul.mubr.msk.f32.vlgmr.msra.gmra.mrb[10].mxu0 %vm838_vm5, %v822_v24  ;;  %v824_v37 = vmax.f32 %v816_v26, 0.0  ;;  %v4483_v16 = vpack.c.bf16 %v1301_v15, %v1300_v14 }
 0x1cc   :  { %v820_v33 = vadd.f32 %v812_v31, %v4822_v21  ;;  %v819_v35 = vadd.f32 %v811_v32, %v4822_v21  ;;  %4174 = vmatprep.mubr.msk.f32.mxu0 %vm838_vm5, %v823_v27  ;;  %v4857_v36 = vpop.f32.mrb[16].mxu1  ;;  %v826_v40 = vmax.f32 %v818_v29, 0.0  ;;  %v1045_v21 = vld [vmem:[%s5418_s3 + $0x80] sm:$0xff]  ;;  %4481 = vmatpush3.bf16.msra.mxu0 %v4480_v13 }
 0x1cd   :  { %v4189_v38 = vpop.f32.mrb[17].mxu1  ;;  %v4475_v45 = vpack.c.bf16 %v1046_v43, %v1045_v21  ;;  %4482 = vmatprep.subr.bf16.mxu0 %v4619_v17  ;;  %v1042_v19 = vadd.f32 %v3813_v18, %v4857_v36 }
 0x1ce   :  { %v827_v41 = vmax.f32 %v819_v35, 0.0  ;;  %v828_v42 = vmax.f32 %v820_v33, 0.0 }
 0x1cf   :  { %4175 = vmatmul.mubr.msk.f32.gmra.mrb[12].mxu0 %vm838_vm5, %v824_v37  ;;  %4476 = vmatprep.subr.bf16.mxu1 %v4475_v45  ;;  %v1184_v20 = vrot.slane %v1042_v19, %v4830_v34  ;;  %v1177_v22 = vcombine.high %v1042_v19, %v1042_v19 }
 0x1d0   :  { %4177 = vmatprep.mubr.msk.f32.mxu0 %vm838_vm5, %v825_v39  ;;  %4478 = vmatpush3.bf16.msra.mxu1 %v4475_v45 }
 0x1d1   :  { %4494 = vmatprep.subr.bf16.mxu1 %v4619_v17  ;;  %4484 = vmatpush3.bf16.msra.mxu0 %v4483_v16  ;;  %v1192_v23 = vcombine.high %v1184_v20, %v1184_v20  ;;  %v1191_v24 = vrot.slane %v1177_v22, %v4830_v34  ;;  %v1200_v27 = vrot.slane %v1184_v20, %v4830_v34 }
 0x1d2   :  { %4485 = vmatprep.subr.bf16.mxu0 %v4619_v17 }
 0x1d3   :  { %4178 = vmatmul.mubr.msk.f32.gmra.mrb[14].mxu0 %vm838_vm5, %v826_v40  ;;  %v1214_v26 = vrot.slane %v1192_v23, %v4830_v34  ;;  %v1193_v31 = vcombine.high %v1191_v24, %v1191_v24  ;;  %v1229_v33 = vrot.slane %v1200_v27, %v4824_v25  ;;  %v1222_v35 = vcombine.high %v1200_v27, %v1200_v27 }
 0x1d4   :  { %4180 = vmatprep.mubr.msk.f32.mxu0 %vm838_vm5, %v827_v41  ;;  %v1207_v45 = vrot.slane %v1191_v24, %v4830_v34 }
 0x1d5   :  { %v1233_v28 = vrot.slane %v1214_v26, %v4824_v25  ;;  %v1224_v29 = vcombine.high %v1214_v26, %v1214_v26  ;;  %v1221_v41 = vrot.slane %v1193_v31, %v4830_v34  ;;  %v1237_v43 = vrot.slane %v1222_v35, %v4824_v25 }
 0x1d6   :  { %v1223_v9 = vcombine.high %v1207_v45, %v1207_v45 }
 0x1d7   :  { %4181 = vmatmul.mubr.msk.f32.gmra.mrb[16].mxu0 %vm838_vm5, %v828_v42  ;;  %v1241_v40 = vrot.slane %v1224_v29, %v4824_v25 }
 0x1d8   :  { %4214 = vmatprep.mubr.msk.f32.mxu0 %vm4618_vm1, %v4617_v2  ;;  %v1253_v24 = vrot.slane %v1223_v9, %v4824_v25  ;;  %v1613_v9 = vld [vmem:[%s5418_s3 + $0x108] sm:$0xff] }
 0x29e   :  { %v4173_v49 = vpop.f32.mrb[10].mxu0 }
 0x29f   :  { %v929_v51 = vpop.f32.mrb[11].mxu0  ;;  %v4884_v54 = vadd.f32 %v4173_v49, %v3804_v46 }
 0x2a0   :  { %v4882_v52 = vadd.f32 %v3804_v46, %v929_v51 }
 0x2a2   :  { %v4176_v55 = vpop.f32.mrb[12].mxu0  ;;  %4194 = vmatprep.mubr.msk.f32.mxu1 %vm355_vm4, %v4882_v52 }
 0x2a3   :  { %v939_v56 = vpop.f32.mrb[13].mxu0  ;;  %4195 = vmatmul.mubr.msk.f32.vlgmr.msra.gmra.mrb[18].mxu1 %vm355_vm4, %v4884_v54  ;;  %v4892_v59 = vadd.f32 %v4176_v55, %v3804_v46  ;;  %v1249_v55 = vrot.slane %v1221_v41, %v4824_v25 }
 0x2a4   :  { %v4890_v58 = vadd.f32 %v3804_v46, %v939_v56  ;;  %4496 = vmatpush3.bf16.msra.mxu1 %v4495_v53  ;;  %v1225_v56 = vcombine.high %v1221_v41, %v1221_v41 }
 0x2a5   :  { %4503 = vmatprep.subr.bf16.mxu1 %v4619_v17 }
 0x2a6   :  { %v4179_v61 = vpop.f32.mrb[14].mxu0  ;;  %4197 = vmatprep.mubr.msk.f32.mxu1 %vm355_vm4, %v4890_v58  ;;  %v1257_v18 = vrot.slane %v1225_v56, %v4824_v25  ;;  %v3823_v56 = vld [vmem:[%s5418_s3 + $0xb8] ss:$0 sm:$0xff] }
 0x2a7   :  { %v949_v62 = vpop.f32.mrb[15].mxu0  ;;  %4198 = vmatmul.mubr.msk.f32.gmra.mrb[20].mxu1 %vm355_vm4, %v4892_v59  ;;  %v4901_v0 = vadd.f32 %v4179_v61, %v3804_v46 }
 0x2a8   :  { %v4899_v63 = vadd.f32 %v3804_v46, %v949_v62 }
 0x2aa   :  { %v4182_v1 = vpop.f32.mrb[16].mxu0  ;;  %4200 = vmatprep.mubr.msk.f32.mxu1 %vm355_vm4, %v4899_v63 }
 0x2ab   :  { %v959_v4 = vpop.f32.mrb[17].mxu0  ;;  %4201 = vmatmul.mubr.msk.f32.gmra.mrb[22].mxu1 %vm355_vm4, %v4901_v0  ;;  %v4909_v7 = vadd.f32 %v4182_v1, %v3804_v46 }
 0x2ac   :  { %v4907_v5 = vadd.f32 %v3804_v46, %v959_v4  ;;  %v1245_v4 = vrot.slane %v1207_v45, %v4824_v25 }
 0x2ae   :  { %4203 = vmatprep.mubr.msk.f32.mxu1 %vm355_vm4, %v4907_v5 }
 0x2af   :  { %4204 = vmatmul.mubr.msk.f32.gmra.mrb[24].mxu1 %vm355_vm4, %v4909_v7 }
 0x2b0   :  { %4239 = vmatprep.mubr.msk.f32.mxu1 %vm4618_vm1, %v4617_v2 }
 0x2b3   :  { %4240 = vmatmul.mubr.msk.f32.vlgmr.msra.gmra.mrb[26].mxu1 %vm355_vm4, %v4758_v44 }
 0x2b4   :  { %4257 = vmatprep.mubr.msk.f32.mxu1 %vm4618_vm1, %v4617_v2 }
 0x376   :  { %v4196_v32 = vpop.f32.mrb[18].mxu1 }
 0x377   :  { %v1267_v37 = vadd.f32 %v4196_v32, %v1233_v28  ;;  %v1137_v36 = vpop.f32.mrb[19].mxu1 }
 0x378   :  { %v1266_v38 = vadd.f32 %v1229_v33, %v1137_v36 }
 0x379   :  { %v1275_v39 = vmax.f32 %v1267_v37, 0.0 }
 0x37a   :  { %v1274_v42 = vmax.f32 %v1266_v38, 0.0  ;;  %v4199_v21 = vpop.f32.mrb[20].mxu1 }
 0x37b   :  { %v1283_v46 = vsel %vm838_vm5, %v1275_v39, 0.0  ;;  %v1269_v47 = vadd.f32 %v4199_v21, %v1241_v40  ;;  %v1147_v48 = vpop.f32.mrb[21].mxu1  ;;  %v1383_v21 = vld [vmem:[%s5418_s3 + $0xd8] sm:$0xff] }
 0x37c   :  { %v1282_v49 = vsel %vm838_vm5, %v1274_v42, 0.0  ;;  %v1268_v51 = vadd.f32 %v1237_v43, %v1147_v48  ;;  %v1382_v42 = vld [vmem:[%s5418_s3 + $0xd0] sm:$0xff]  ;;  %v1384_v48 = vld [vmem:[%s5418_s3 + $0xe0] sm:$0xff] }
 0x37d   :  { %v1284_v53 = vadd.f32 %v1283_v46, %v1282_v49  ;;  %v1277_v61 = vmax.f32 %v1269_v47, 0.0  ;;  %v4486_v46 = vpack.c.bf16 %v1383_v21, %v1382_v42  ;;  %v1385_v49 = vld [vmem:[%s5418_s3 + $0xe8] sm:$0xff] }
 0x37e   :  { %v1276_v62 = vmax.f32 %v1268_v51, 0.0  ;;  %v4202_v1 = vpop.f32.mrb[22].mxu1  ;;  %v4489_v51 = vpack.c.bf16 %v1385_v49, %v1384_v48 }
 0x37f   :  { %v1271_v12 = vadd.f32 %v4202_v1, %v1249_v55  ;;  %v1157_v13 = vpop.f32.mrb[23].mxu1  ;;  %v1287_v19 = vsel %vm838_vm5, %v1277_v61, 0.0  ;;  %v1381_v55 = vld [vmem:[%s5418_s3 + $0xc8] sm:$0xff] }
 0x380   :  { %v1285_v14 = vsel %vm838_vm5, %v1276_v62, 0.0  ;;  %v1270_v15 = vadd.f32 %v1245_v4, %v1157_v13 }
 0x381   :  { %v1286_v16 = vadd.f32 %v1285_v14, %v1284_v53  ;;  %v1279_v20 = vmax.f32 %v1271_v12, 0.0  ;;  %v1380_v53 = vld [vmem:[%s5418_s3 + $0xc0] sm:$0xff]  ;;  %v1614_v12 = vld [vmem:[%s5418_s3 + $0x110] sm:$0xff]  ;;  %v1615_v14 = vld [vmem:[%s5418_s3 + $0x118] sm:$0xff] }
 0x382   :  { %v1278_v22 = vmax.f32 %v1270_v15, 0.0  ;;  %v4205_v23 = vpop.f32.mrb[24].mxu1  ;;  %v4492_v62 = vpack.c.bf16 %v1381_v55, %v1380_v53  ;;  %v4498_v13 = vpack.c.bf16 %v1614_v12, %v1613_v9  ;;  %v1616_v15 = vld [vmem:[%s5418_s3 + $0x120] sm:$0xff]  ;;  %v1850_v12 = vld [vmem:[%s5418_s3 + $0x150] sm:$0x1] }
 0x383   :  { %v1288_v26 = vadd.f32 %v1287_v19, %v1286_v16  ;;  %v1273_v27 = vadd.f32 %v4205_v23, %v1257_v18  ;;  %v1167_v28 = vpop.f32.mrb[25].mxu1  ;;  %v1291_v33 = vsel %vm838_vm5, %v1279_v20, 0.0  ;;  %v4501_v16 = vpack.c.bf16 %v1616_v15, %v1615_v14  ;;  %v1854_v53 = vld [vmem:[%s5418_s3 + $0x160] sm:$0xff]  ;;  %v3842_v15 = vld [vmem:[%s5418_s3 + $0x190] sm:$0xff] }
 0x384   :  { %v1289_v29 = vsel %vm838_vm5, %v1278_v22, 0.0  ;;  %v1272_v31 = vadd.f32 %v1253_v24, %v1167_v28 }
 0x385   :  { %v1290_v32 = vadd.f32 %v1289_v29, %v1288_v26  ;;  %v1281_v35 = vmax.f32 %v1273_v27, 0.0  ;;  %v3828_v26 = vld [vmem:[%s5418_s3 + $0x100] ss:$0 sm:$0xff] }
 0x386   :  { %v1280_v37 = vmax.f32 %v1272_v31, 0.0  ;;  %v1597_v36 = vpop.f32.mrb[26].mxu1  ;;  %v1705_v31 = vld [vmem:[%s5418_s3 + $0x140] sm:$0xff] }
 0x387   :  { %v1292_v38 = vadd.f32 %v1291_v33, %v1290_v32  ;;  %v4241_v39 = vpop.f32.mrb[27].mxu1  ;;  %v1295_v43 = vsel %vm838_vm5, %v1281_v35, 0.0  ;;  %v1604_v22 = vrot.slane %v1597_v36, %v4824_v25  ;;  %v1706_v32 = vld [vmem:[%s5418_s3 + $0x148] sm:$0xff] }
 0x388   :  { %v1293_v40 = vsel %vm838_vm5, %v1280_v37, 0.0  ;;  %v4504_v33 = vpack.c.bf16 %v1706_v32, %v1705_v31  ;;  %v3829_v35 = vld [vmem:[%s5418_s3 + $0x128] ss:$0 sm:$0xff]  ;;  %v3845_v31 = vld [vmem:[%s5418_s3 + $0x1a0] sm:$0xff] }
 0x389   :  { %v1294_v41 = vadd.f32 %v1293_v40, %v1292_v38  ;;  %v3846_v32 = vld [vmem:[%s5418_s3 + $0x1a8] sm:$0xff] }
 0x38a   :  { %4505 = vmatpush3.bf16.msra.mxu1 %v4504_v33 }
 0x38b   :  { %v1296_v45 = vadd.f32 %v1295_v43, %v1294_v41  ;;  %4506 = vmatprep.subr.bf16.mxu1 %v4619_v17 }
 0x38d   :  { %v1297_v47 = vmul.f32 0.125, %v1296_v45  ;;  %v1703_v45 = vld [vmem:[%s5418_s3 + $0x130] sm:$0xff] }
 0x38f   :  { %4215 = vmatmul.mubr.msk.f32.vlgmr.msra.gmra.mrb[18].mxu0 %vm838_vm5, %v1297_v47 }
 0x390   :  { %4487 = vmatpush3.bf16.msra.mxu0 %v4486_v46  ;;  %4225 = vmatprep.mubr.msk.f32.mxu0 %vm4618_vm1, %v4617_v2  ;;  %v1704_v46 = vld [vmem:[%s5418_s3 + $0x138] sm:$0xff] }
 0x391   :  { %4488 = vmatprep.subr.bf16.mxu0 %v4619_v17  ;;  %v4507_v48 = vpack.c.bf16 %v1704_v46, %v1703_v45  ;;  %v1934_v45 = vadd.f32 %v4890_v58, %v4776_v60  ;;  %v1938_v60 = vadd.f32 %v4907_v5, %v4793_v10 }
 0x394   :  { %4490 = vmatpush3.bf16.msra.mxu0 %v4489_v51  ;;  %v1853_v51 = vld [vmem:[%s5418_s3 + $0x158] sm:$0xff] }
 0x395   :  { %4491 = vmatprep.subr.bf16.mxu0 %v4619_v17  ;;  %v4510_v55 = vpack.c.bf16 %v1854_v53, %v1853_v51 }
 0x462   :  { %v1376_v61 = vpop.f32.mrb[18].mxu0 }
 0x463   :  { %v1377_v1 = vadd.f32 %v3823_v56, %v1376_v61  ;;  %v4216_v4 = vpop.f32.mrb[19].mxu0  ;;  %v1855_v56 = vld [vmem:[%s5418_s3 + $0x168] sm:$0xff]  ;;  %v1856_v61 = vld [vmem:[%s5418_s3 + $0x170] sm:$0xff] }
 0x465   :  { %4226 = vmatmul.mubr.msk.f32.vlgmr.msra.gmra.mrb[20].mxu0 %vm838_vm5, %v1377_v1 }
 0x466   :  { %4493 = vmatpush3.bf16.msra.mxu0 %v4492_v62  ;;  %4232 = vmatprep.mubr.msk.f32.mxu0 %vm4618_vm1, %v4617_v2  ;;  %v4513_v62 = vpack.c.bf16 %v1856_v61, %v1855_v56 }
 0x467   :  { %4497 = vmatprep.subr.bf16.mxu0 %v4619_v17 }
 0x469   :  { %4233 = vmatmul.mubr.msk.f32.vlgmr.msra.gmra.mrb[22].mxu0 %vm355_vm4, %v4742_v30 }
 0x46a   :  { %4250 = vmatprep.mubr.msk.f32.mxu0 %vm4618_vm1, %v4617_v2  ;;  %4499 = vmatpush3.bf16.msra.mxu0 %v4498_v13 }
 0x46b   :  { %4500 = vmatprep.subr.bf16.mxu0 %v4619_v17 }
 0x46e   :  { %4502 = vmatpush3.bf16.msra.mxu0 %v4501_v16  ;;  %v3843_v16 = vld [vmem:[%s5418_s3 + $0x198] sm:$0xff] }
 0x46f   :  { %4509 = vmatprep.subr.bf16.mxu0 %v4619_v17 }
 0x538   :  { %v1455_v18 = vpop.f32.mrb[20].mxu0 }
 0x539   :  { %v4227_v19 = vpop.f32.mrb[21].mxu0 }
 0x53a   :  { %v4522_v19 = vpack.c.bf16 %v3843_v16, %v3842_v15 }
 0x53c   :  { %v1525_v20 = vpop.f32.mrb[22].mxu0 }
 0x53d   :  { %v1526_v23 = vadd.f32 %v1525_v20, %v1455_v18  ;;  %v4234_v24 = vpop.f32.mrb[23].mxu0 }
 0x53e   :  { %v3837_v24 = vld [vmem:[%s5418_s3 + $0x1b8] sm:$0xff] }
 0x53f   :  { %v1605_v27 = vadd.f32 %v1604_v22, %v1526_v23  ;;  %v3836_v23 = vld [vmem:[%s5418_s3 + $0x1b0] sm:$0xff] }
 0x541   :  { %v1611_v28 = vadd.f32 %v3828_v26, %v1605_v27  ;;  %v4516_v26 = vpack.c.bf16 %v3837_v24, %v3836_v23  ;;  %v3834_v27 = vld [vmem:[%s5418_s3 + $0x180] sm:$0xff] }
 0x543   :  { %v1612_v29 = vmax.f32 %v1611_v28, 0.0  ;;  %v3835_v28 = vld [vmem:[%s5418_s3 + $0x188] sm:$0xff] }
 0x545   :  { %4251 = vmatmul.mubr.msk.f32.vlgmr.msra.gmra.mrb[24].mxu0 %vm838_vm5, %v1612_v29 }
 0x546   :  { %4275 = vmatprep.mubr.msk.f32.mxu0 %vm4618_vm1, %v4617_v2  ;;  %4511 = vmatpush3.bf16.msra.mxu0 %v4510_v55 }
 0x547   :  { %4512 = vmatprep.subr.bf16.mxu0 %v4619_v17 }
 0x54a   :  { %4514 = vmatpush3.bf16.msra.mxu0 %v4513_v62 }
 0x54b   :  { %4521 = vmatprep.subr.bf16.mxu0 %v4619_v17 }
 0x618   :  { %v1691_v37 = vpop.f32.mrb[24].mxu0 }
 0x619   :  { %v1692_v36 = vadd.f32 %v3829_v35, %v1691_v37  ;;  %v4252_v38 = vpop.f32.mrb[25].mxu0  ;;  %v4519_v37 = vpack.c.bf16 %v3835_v28, %v3834_v27 }
 0x61a   :  { %v4524_v38 = vpack.c.bf16 %v3846_v32, %v3845_v31 }
 0x61b   :  { %v1695_v39 = vsel %vm355_vm4, %v1692_v36, 0.0  ;;  %v5068_v22 = vadd.f32 %v1692_v36, %v4742_v30  ;;  %v1857_v30 = vld [vmem:[%s5418_s3 + $0x178] sm:$0x1] }
 0x61c   :  { %v1696_v40 = vrot.slane %v1695_v39, 4 }
 0x61e   :  { %v1697_v41 = vadd.f32 %v1696_v40, %v1695_v39 }
 0x620   :  { %v1698_v42 = vrot.slane %v1697_v41, 2 }
 0x622   :  { %v1699_v21 = vadd.f32 %v1698_v42, %v1697_v41  ;;  %v3869_v41 = vld [vmem:[%s5418_s3 + $0x1f0] sm:$0xff]  ;;  %v1932_v42 = vadd.f32 %v4882_v52, %v4762_v50  ;;  %v1935_v50 = vadd.f32 %v4892_v59, %v4781_v3  ;;  %v1936_v52 = vadd.f32 %v4899_v63, %v4785_v6  ;;  %v3855_v6 = vld [vmem:[%s5418_s3 + $0x1c8] sm:$0xff] }
 0x623   :  { %v1939_v3 = vadd.f32 %v4909_v7, %v4797_v11  ;;  %v3857_v11 = vld [vmem:[%s5418_s3 + $0x1d8] sm:$0xff]  ;;  %v3841_v7 = vld [vmem:[%s5418_s3 + $0x1c0] ss:$0 sm:$0xff] }
 0x624   :  { %v1700_v43 = vrot.slane %v1699_v21, 1 }
 0x626   :  { %v1701_v47 = vadd.f32 %v1700_v43, %v1699_v21  ;;  %v1933_v43 = vadd.f32 %v4884_v54, %v4772_v57  ;;  %v1937_v57 = vadd.f32 %v4901_v0, %v4789_v8  ;;  %v3856_v8 = vld [vmem:[%s5418_s3 + $0x1d0] sm:$0xff]  ;;  %v3858_v54 = vld [vmem:[%s5418_s3 + $0x1e0] sm:$0xff] }
 0x627   :  { %v4528_v10 = vpack.c.bf16 %v3856_v8, %v3855_v6  ;;  %v4532_v58 = vpack.c.bf16 %v3858_v54, %v3857_v11 }
 0x628   :  { %v1702_v49 = vmul.f32 0.125, %v1701_v47 }
 0x62a   :  { %4258 = vmatmul.mubr.msk.f32.vlgmr.msra.gmra.mrb[28].mxu1 %vm355_vm4, %v1702_v49 }
 0x62b   :  { %4508 = vmatpush3.bf16.msra.mxu1 %v4507_v48  ;;  %4264 = vmatprep.mubr.msk.f32.mxu1 %vm4618_vm1, %v4617_v2 }
 0x62c   :  { %4515 = vmatprep.subr.bf16.mxu1 %v4619_v17 }
 0x62e   :  { %4265 = vmatmul.mubr.msk.f32.vlgmr.msra.gmra.mrb[30].mxu1 %vm355_vm4, %v4758_v44 }
 0x62f   :  { %4282 = vmatprep.mubr.msk.f32.mxu1 %vm4618_vm1, %v4617_v2  ;;  %4517 = vmatpush3.bf16.msra.mxu1 %v4516_v26 }
 0x630   :  { %4518 = vmatprep.subr.bf16.mxu1 %v4619_v17 }
 0x6fd   :  { %v1776_v1 = vpop.f32.mrb[28].mxu1 }
 0x6fe   :  { %v4259_v4 = vpop.f32.mrb[29].mxu1 }
 0x701   :  { %v1846_v9 = vpop.f32.mrb[30].mxu1 }
 0x702   :  { %v1847_v13 = vadd.f32 %v1846_v9, %v1776_v1  ;;  %v4266_v14 = vpop.f32.mrb[31].mxu1 }
 0x704   :  { %v1851_v18 = vadd.f32 %v1850_v12, %v1847_v13 }
 0x706   :  { %v1852_v20 = vmax.f32 %v1851_v18, 0.0 }
 0x708   :  { %4276 = vmatmul.mubr.msk.f32.vlgmr.msra.gmra.mrb[26].mxu0 %vm838_vm5, %v1852_v20 }
 0x709   :  { %4523 = vmatpush3.bf16.msra.mxu0 %v4522_v19  ;;  %4296 = vmatprep.mubr.msk.f32.mxu0 %vm4618_vm1, %v4617_v2 }
 0x70a   :  { %4529 = vmatprep.subr.bf16.mxu0 %v4528_v10 }
 0x70c   :  { %4297 = vmatmul.mubr.msk.f32.vlgmr.msra.gmra.mrb[28].mxu0 %vm355_vm4, %v5068_v22 }
 0x70d   :  { %4531 = vmatpush3.bf16.msra.mxu0 %v4528_v10 }
 0x70e   :  { %4533 = vmatprep.subr.bf16.mxu0 %v4532_v58 }
 0x711   :  { %4535 = vmatpush3.bf16.msra.mxu0 %v4532_v58 }
 0x712   :  { %4543 = vmatprep.subr.bf16.mxu0 %v4619_v17 }
 0x7db   :  { %v1927_v29 = vpop.f32.mrb[26].mxu0 }
 0x7dc   :  { %v1928_v33 = vadd.f32 %v1927_v29, %v1857_v30  ;;  %v4277_v35 = vpop.f32.mrb[27].mxu0 }
 0x7de   :  { %v5095_v36 = vadd.f32 %v1928_v33, %v4758_v44  ;;  %v3870_v44 = vld [vmem:[%s5418_s3 + $0x1f8] sm:$0xff] }
 0x7df   :  { %v5097_v39 = vpop.f32.mrb[28].mxu0  ;;  %v4537_v21 = vpack.c.bf16 %v3870_v44, %v3869_v41 }
 0x7e0   :  { %4283 = vmatmul.mubr.msk.f32.vlgmr.msra.gmra.mrb[32].mxu1 %vm355_vm4, %v5095_v36  ;;  %v4298_v40 = vpop.f32.mrb[29].mxu0 }
 0x7e1   :  { %4520 = vmatpush3.bf16.msra.mxu1 %v4519_v37  ;;  %4289 = vmatprep.mubr.msk.f32.mxu1 %vm4618_vm1, %v4617_v2 }
 0x7e2   :  { %4525 = vmatprep.subr.bf16.mxu1 %v4524_v38 }
 0x7e4   :  { %4290 = vmatmul.mubr.msk.f32.vlgmr.msra.gmra.mrb[34].mxu1 %vm355_vm4, %v5068_v22 }
 0x7e5   :  { %4527 = vmatpush3.bf16.msra.mxu1 %v4524_v38  ;;  %4303 = vmatprep.mubr.msk.f32.mxu1 %vm355_vm4, %v1932_v42 }
 0x7e6   :  { %4536 = vmatprep.subr.bf16.mxu1 %v4619_v17 }
 0x7e8   :  { %4304 = vmatmul.mubr.msk.f32.vlgmr.msra.gmra.mrb[36].mxu1 %vm355_vm4, %v1933_v43 }
 0x7e9   :  { %4306 = vmatprep.mubr.msk.f32.mxu1 %vm355_vm4, %v1934_v45  ;;  %4538 = vmatpush3.bf16.msra.mxu1 %v4537_v21 }
 0x7ec   :  { %4307 = vmatmul.mubr.msk.f32.gmra.mrb[38].mxu1 %vm355_vm4, %v1935_v50 }
 0x7ed   :  { %4309 = vmatprep.mubr.msk.f32.mxu1 %vm355_vm4, %v1936_v52 }
 0x7f0   :  { %4310 = vmatmul.mubr.msk.f32.gmra.mrb[40].mxu1 %vm355_vm4, %v1937_v57 }
 0x7f1   :  { %4312 = vmatprep.mubr.msk.f32.mxu1 %vm355_vm4, %v1938_v60 }
 0x7f4   :  { %4313 = vmatmul.mubr.msk.f32.gmra.mrb[42].mxu1 %vm355_vm4, %v1939_v3 }
 0x7f5   :  { %4339 = vmatprep.mubr.msk.f32.mxu1 %vm4618_vm1, %v4617_v2 }
 0x7f8   :  { %4340 = vmatmul.mubr.msk.f32.vlgmr.msra.gmra.mrb[44].mxu1 %vm355_vm4, %v5068_v22 }
 0x8b3   :  { %v2015_v59 = vpop.f32.mrb[32].mxu1 }
 0x8b4   :  { %v4284_v63 = vpop.f32.mrb[33].mxu1  ;;  %v2022_v0 = vrot.slane %v2015_v59, %v4824_v25 }
 0x8b7   :  { %v2092_v5 = vpop.f32.mrb[34].mxu1 }
 0x8b8   :  { %v2093_v46 = vadd.f32 %v2092_v5, %v2022_v0  ;;  %v4291_v47 = vpop.f32.mrb[35].mxu1 }
 0x8b9   :  { %v3875_v47 = vld [vmem:[%s5418_s3 + $0x208] sm:$0xff] }
 0x8ba   :  { %v2101_v48 = vadd.f32 %v3841_v7, %v2093_v46 }
 0x8bb   :  { %v4305_v49 = vpop.f32.mrb[36].mxu1 }
 0x8bc   :  { %v2306_v51 = vcombine.high %v2101_v48, %v2101_v48  ;;  %v2313_v53 = vrot.slane %v2101_v48, %v4830_v34  ;;  %v2266_v55 = vpop.f32.mrb[37].mxu1 }
 0x8be   :  { %v2320_v56 = vrot.slane %v2306_v51, %v4830_v34  ;;  %v2321_v61 = vcombine.high %v2313_v53, %v2313_v53  ;;  %v2329_v62 = vrot.slane %v2313_v53, %v4830_v34  ;;  %v3899_v51 = vld [vmem:[%s5418_s3 + $0x270] sm:$0xff]  ;;  %v3900_v53 = vld [vmem:[%s5418_s3 + $0x278] sm:$0xff] }
 0x8bf   :  { %v4308_v1 = vpop.f32.mrb[38].mxu1 }
 0x8c0   :  { %v2343_v4 = vrot.slane %v2321_v61, %v4830_v34  ;;  %v2358_v9 = vrot.slane %v2329_v62, %v4824_v25  ;;  %v2276_v12 = vpop.f32.mrb[39].mxu1  ;;  %v2351_v13 = vcombine.high %v2329_v62, %v2329_v62  ;;  %v2322_v14 = vcombine.high %v2320_v56, %v2320_v56 }
 0x8c1   :  { %v2336_v15 = vrot.slane %v2320_v56, %v4830_v34  ;;  %v4559_v62 = vpack.c.bf16 %v3900_v53, %v3899_v51 }
 0x8c2   :  { %v2362_v16 = vrot.slane %v2343_v4, %v4824_v25  ;;  %v2395_v18 = vadd.f32 %v2358_v9, %v2266_v55  ;;  %v2353_v19 = vcombine.high %v2343_v4, %v2343_v4  ;;  %v2366_v20 = vrot.slane %v2351_v13, %v4824_v25 }
 0x8c3   :  { %v4311_v23 = vpop.f32.mrb[40].mxu1  ;;  %v2350_v24 = vrot.slane %v2322_v14, %v4830_v34  ;;  %v2374_v26 = vrot.slane %v2336_v15, %v4824_v25  ;;  %v2352_v30 = vcombine.high %v2336_v15, %v2336_v15 }
 0x8c4   :  { %v2396_v27 = vadd.f32 %v4305_v49, %v2362_v16  ;;  %v2403_v28 = vadd.f32 %v2395_v18, %v5097_v39  ;;  %v2370_v29 = vrot.slane %v2353_v19, %v4824_v25  ;;  %v2397_v31 = vadd.f32 %v2366_v20, %v2276_v12  ;;  %v2286_v32 = vpop.f32.mrb[41].mxu1  ;;  %v3860_v49 = vld [vmem:[%s5418_s3 + $0x1e8] ss:$0 sm:$0xff] }
 0x8c5   :  { %v2378_v33 = vrot.slane %v2350_v24, %v4824_v25  ;;  %v2399_v35 = vadd.f32 %v2374_v26, %v2286_v32  ;;  %v2354_v37 = vcombine.high %v2350_v24, %v2350_v24  ;;  %v2382_v50 = vrot.slane %v2352_v30, %v4824_v25  ;;  %v3884_v26 = vld [vmem:[%s5418_s3 + $0x218] sm:$0xff]  ;;  %v3885_v30 = vld [vmem:[%s5418_s3 + $0x220] sm:$0xff]  ;;  %v3872_v32 = vld [vmem:[%s5418_s3 + $0x210] ss:$0 sm:$0xff] }
 0x8c6   :  { %v2404_v38 = vadd.f32 %v2396_v27, %v5097_v39  ;;  %v2411_v40 = vmax.f32 %v2403_v28, 0.0  ;;  %v2398_v41 = vadd.f32 %v4308_v1, %v2370_v29  ;;  %v2405_v44 = vadd.f32 %v2397_v31, %v5097_v39  ;;  %v3886_v28 = vld [vmem:[%s5418_s3 + $0x228] sm:$0xff]  ;;  %v3887_v29 = vld [vmem:[%s5418_s3 + $0x230] sm:$0xff] }
 0x8c7   :  { %v2400_v42 = vadd.f32 %v4311_v23, %v2378_v33  ;;  %v2407_v21 = vadd.f32 %v2399_v35, %v5097_v39  ;;  %v4314_v43 = vpop.f32.mrb[42].mxu1  ;;  %v2386_v45 = vrot.slane %v2354_v37, %v4824_v25  ;;  %v4544_v27 = vpack.c.bf16 %v3885_v30, %v3884_v26 }
 0x8c8   :  { %v2412_v52 = vmax.f32 %v2404_v38, 0.0  ;;  %v2406_v57 = vadd.f32 %v2398_v41, %v5097_v39  ;;  %v2413_v60 = vmax.f32 %v2405_v44, 0.0  ;;  %v2296_v3 = vpop.f32.mrb[43].mxu1  ;;  %4323 = vmatprep.mubr.msk.f32.mxu0 %vm838_vm5, %v2411_v40  ;;  %v4547_v31 = vpack.c.bf16 %v3887_v29, %v3886_v28 }
 0x8c9   :  { %v2408_v6 = vadd.f32 %v2400_v42, %v5097_v39  ;;  %v2402_v8 = vadd.f32 %v4314_v43, %v2386_v45  ;;  %v2401_v10 = vadd.f32 %v2382_v50, %v2296_v3  ;;  %v2415_v0 = vmax.f32 %v2407_v21, 0.0 }
 0x8ca   :  { %4324 = vmatmul.mubr.msk.f32.vlgmr.msra.gmra.mrb[30].mxu0 %vm838_vm5, %v2412_v52  ;;  %v2414_v59 = vmax.f32 %v2406_v57, 0.0 }
 0x8cb   :  { %v2410_v11 = vadd.f32 %v2402_v8, %v5097_v39  ;;  %v2409_v54 = vadd.f32 %v2401_v10, %v5097_v39  ;;  %4326 = vmatprep.mubr.msk.f32.mxu0 %vm838_vm5, %v2413_v60  ;;  %v5182_v58 = vpop.f32.mrb[44].mxu1  ;;  %v2416_v5 = vmax.f32 %v2408_v6, 0.0  ;;  %v3874_v39 = vld [vmem:[%s5418_s3 + $0x200] sm:$0xff]  ;;  %4545 = vmatpush3.bf16.msra.mxu0 %v4544_v27 }
 0x8cc   :  { %v4341_v63 = vpop.f32.mrb[45].mxu1  ;;  %v4539_v48 = vpack.c.bf16 %v3875_v47, %v3874_v39  ;;  %4546 = vmatprep.subr.bf16.mxu0 %v4619_v17  ;;  %v2631_v33 = vadd.f32 %v3872_v32, %v5182_v58 }
 0x8cd   :  { %v2417_v7 = vmax.f32 %v2409_v54, 0.0  ;;  %v2418_v46 = vmax.f32 %v2410_v11, 0.0 }
 0x8ce   :  { %4327 = vmatmul.mubr.msk.f32.gmra.mrb[32].mxu0 %vm838_vm5, %v2414_v59  ;;  %4540 = vmatprep.subr.bf16.mxu1 %v4539_v48  ;;  %v2773_v35 = vrot.slane %v2631_v33, %v4830_v34  ;;  %v2766_v37 = vcombine.high %v2631_v33, %v2631_v33 }
 0x8cf   :  { %4329 = vmatprep.mubr.msk.f32.mxu0 %vm838_vm5, %v2415_v0  ;;  %4542 = vmatpush3.bf16.msra.mxu1 %v4539_v48 }
 0x8d0   :  { %4558 = vmatprep.subr.bf16.mxu1 %v4619_v17  ;;  %4548 = vmatpush3.bf16.msra.mxu0 %v4547_v31  ;;  %v2781_v38 = vcombine.high %v2773_v35, %v2773_v35  ;;  %v2780_v40 = vrot.slane %v2766_v37, %v4830_v34  ;;  %v2789_v44 = vrot.slane %v2773_v35, %v4830_v34  ;;  %v3893_v37 = vld [vmem:[%s5418_s3 + $0x250] sm:$0xff] }
 0x8d1   :  { %4549 = vmatprep.subr.bf16.mxu0 %v4619_v17 }
 0x8d2   :  { %4330 = vmatmul.mubr.msk.f32.gmra.mrb[34].mxu0 %vm838_vm5, %v2416_v5  ;;  %v2803_v41 = vrot.slane %v2781_v38, %v4830_v34  ;;  %v2782_v43 = vcombine.high %v2780_v40, %v2780_v40  ;;  %v2818_v50 = vrot.slane %v2789_v44, %v4824_v25  ;;  %v2811_v52 = vcombine.high %v2789_v44, %v2789_v44  ;;  %v3894_v38 = vld [vmem:[%s5418_s3 + $0x258] sm:$0xff] }
 0x8d3   :  { %4332 = vmatprep.mubr.msk.f32.mxu0 %vm838_vm5, %v2417_v7  ;;  %v2796_v59 = vrot.slane %v2780_v40, %v4830_v34  ;;  %v4550_v44 = vpack.c.bf16 %v3894_v38, %v3893_v37 }
 0x8d4   :  { %v2822_v42 = vrot.slane %v2803_v41, %v4824_v25  ;;  %v2813_v21 = vcombine.high %v2803_v41, %v2803_v41  ;;  %v2810_v10 = vrot.slane %v2782_v43, %v4830_v34  ;;  %v2826_v58 = vrot.slane %v2811_v52, %v4824_v25  ;;  %v3896_v43 = vld [vmem:[%s5418_s3 + $0x268] sm:$0xff] }
 0x8d5   :  { %v3892_v52 = vld [vmem:[%s5418_s3 + $0x248] sm:$0xff] }
 0x8d6   :  { %4333 = vmatmul.mubr.msk.f32.gmra.mrb[36].mxu0 %vm838_vm5, %v2418_v46  ;;  %v2830_v8 = vrot.slane %v2813_v21, %v4824_v25  ;;  %v2838_v47 = vrot.slane %v2810_v10, %v4824_v25  ;;  %v2814_v48 = vcombine.high %v2810_v10, %v2810_v10  ;;  %v3895_v21 = vld [vmem:[%s5418_s3 + $0x260] sm:$0xff]  ;;  %v3904_v10 = vld [vmem:[%s5418_s3 + $0x288] sm:$0xff] }
 0x8d7   :  { %4366 = vmatprep.mubr.msk.f32.mxu0 %vm4618_vm1, %v4617_v2 }
 0x99d   :  { %v4325_v55 = vpop.f32.mrb[30].mxu0 }
 0x99e   :  { %v2518_v56 = vpop.f32.mrb[31].mxu0  ;;  %v2524_v1 = vadd.f32 %v4325_v55, %v3860_v49  ;;  %v2834_v55 = vrot.slane %v2796_v59, %v4824_v25 }
 0x99f   :  { %v2519_v61 = vadd.f32 %v3860_v49, %v2518_v56  ;;  %v2812_v56 = vcombine.high %v2796_v59, %v2796_v59  ;;  %v3907_v59 = vld [vmem:[%s5418_s3 + $0x2a0] sm:$0xff] }
 0x9a1   :  { %v4328_v4 = vpop.f32.mrb[32].mxu0  ;;  %4346 = vmatprep.mubr.msk.f32.mxu1 %vm355_vm4, %v2519_v61 }
 0x9a2   :  { %v2528_v9 = vpop.f32.mrb[33].mxu0  ;;  %4347 = vmatmul.mubr.msk.f32.vlgmr.msra.gmra.mrb[46].mxu1 %vm355_vm4, %v2524_v1  ;;  %v2534_v13 = vadd.f32 %v4328_v4, %v3860_v49 }
 0x9a3   :  { %v2529_v12 = vadd.f32 %v3860_v49, %v2528_v9  ;;  %4560 = vmatpush3.bf16.msra.mxu1 %v4559_v62  ;;  %v2846_v9 = vrot.slane %v2814_v48, %v4824_v25  ;;  %v3903_v48 = vld [vmem:[%s5418_s3 + $0x280] ss:$0 sm:$0xff] }
 0x9a4   :  { %4567 = vmatprep.subr.bf16.mxu1 %v4619_v17 }
 0x9a5   :  { %v4331_v14 = vpop.f32.mrb[34].mxu0  ;;  %4349 = vmatprep.mubr.msk.f32.mxu1 %vm355_vm4, %v2529_v12 }
 0x9a6   :  { %v2538_v15 = vpop.f32.mrb[35].mxu0  ;;  %4350 = vmatmul.mubr.msk.f32.gmra.mrb[48].mxu1 %vm355_vm4, %v2534_v13  ;;  %v2544_v18 = vadd.f32 %v4331_v14, %v3860_v49 }
 0x9a7   :  { %v2539_v16 = vadd.f32 %v3860_v49, %v2538_v15 }
 0x9a9   :  { %v4334_v19 = vpop.f32.mrb[36].mxu0  ;;  %4352 = vmatprep.mubr.msk.f32.mxu1 %vm355_vm4, %v2539_v16  ;;  %v2842_v16 = vrot.slane %v2812_v56, %v4824_v25 }
 0x9aa   :  { %v2548_v20 = vpop.f32.mrb[37].mxu0  ;;  %4353 = vmatmul.mubr.msk.f32.gmra.mrb[50].mxu1 %vm355_vm4, %v2544_v18  ;;  %v2554_v24 = vadd.f32 %v4334_v19, %v3860_v49 }
 0x9ab   :  { %v2549_v23 = vadd.f32 %v3860_v49, %v2548_v20 }
 0x9ad   :  { %4355 = vmatprep.mubr.msk.f32.mxu1 %vm355_vm4, %v2549_v23 }
 0x9ae   :  { %4356 = vmatmul.mubr.msk.f32.gmra.mrb[52].mxu1 %vm355_vm4, %v2554_v24 }
 0x9af   :  { %4391 = vmatprep.mubr.msk.f32.mxu1 %vm4618_vm1, %v4617_v2 }
 0x9b2   :  { %4392 = vmatmul.mubr.msk.f32.vlgmr.msra.gmra.mrb[54].mxu1 %vm355_vm4, %v5095_v36 }
 0x9b3   :  { %4409 = vmatprep.mubr.msk.f32.mxu1 %vm4618_vm1, %v4617_v2 }
 0xa75   :  { %v4348_v45 = vpop.f32.mrb[46].mxu1 }
 0xa76   :  { %v2856_v57 = vadd.f32 %v4348_v45, %v2822_v42  ;;  %v2726_v60 = vpop.f32.mrb[47].mxu1  ;;  %v4553_v45 = vpack.c.bf16 %v3896_v43, %v3895_v21 }
 0xa77   :  { %v2855_v3 = vadd.f32 %v2818_v50, %v2726_v60  ;;  %v3891_v50 = vld [vmem:[%s5418_s3 + $0x240] sm:$0xff] }
 0xa78   :  { %v2864_v6 = vmax.f32 %v2856_v57, 0.0  ;;  %v3889_v57 = vld [vmem:[%s5418_s3 + $0x238] ss:$0 sm:$0xff] }
 0xa79   :  { %v2863_v11 = vmax.f32 %v2855_v3, 0.0  ;;  %v4351_v54 = vpop.f32.mrb[48].mxu1  ;;  %v4556_v3 = vpack.c.bf16 %v3892_v52, %v3891_v50 }
 0xa7a   :  { %v2872_v63 = vsel %vm838_vm5, %v2864_v6, 0.0  ;;  %v2858_v0 = vadd.f32 %v4351_v54, %v2830_v8  ;;  %v2736_v5 = vpop.f32.mrb[49].mxu1 }
 0xa7b   :  { %v2871_v7 = vsel %vm838_vm5, %v2863_v11, 0.0  ;;  %v2857_v46 = vadd.f32 %v2826_v58, %v2736_v5  ;;  %v3905_v11 = vld [vmem:[%s5418_s3 + $0x290] sm:$0xff]  ;;  %v3906_v58 = vld [vmem:[%s5418_s3 + $0x298] sm:$0xff] }
 0xa7c   :  { %v2873_v39 = vadd.f32 %v2872_v63, %v2871_v7  ;;  %v2866_v49 = vmax.f32 %v2858_v0, 0.0  ;;  %v4562_v54 = vpack.c.bf16 %v3905_v11, %v3904_v10  ;;  %v4565_v63 = vpack.c.bf16 %v3907_v59, %v3906_v58  ;;  %v3606_v59 = vld [vmem:[%s5419_s4 + $0x58] sm:$0x1] }
 0xa7d   :  { %v2865_v51 = vmax.f32 %v2857_v46, 0.0  ;;  %v4354_v53 = vpop.f32.mrb[50].mxu1 }
 0xa7e   :  { %v2860_v61 = vadd.f32 %v4354_v53, %v2838_v47  ;;  %v2746_v62 = vpop.f32.mrb[51].mxu1  ;;  %v2876_v12 = vsel %vm838_vm5, %v2866_v49, 0.0 }
 0xa7f   :  { %v2874_v34 = vsel %vm838_vm5, %v2865_v51, 0.0  ;;  %v2859_v1 = vadd.f32 %v2834_v55, %v2746_v62  ;;  %v3913_v55 = vld [vmem:[%s5418_s3 + $0x2c0] sm:$0xff] }
 0xa80   :  { %v2875_v4 = vadd.f32 %v2874_v34, %v2873_v39  ;;  %v2868_v13 = vmax.f32 %v2860_v61, 0.0  ;;  %v3909_v61 = vld [vmem:[%s5418_s3 + $0x2a8] ss:$0 sm:$0xff] }
 0xa81   :  { %v2867_v14 = vmax.f32 %v2859_v1, 0.0  ;;  %v4357_v15 = vpop.f32.mrb[52].mxu1 }
 0xa82   :  { %v2877_v18 = vadd.f32 %v2876_v12, %v2875_v4  ;;  %v2862_v19 = vadd.f32 %v4357_v15, %v2846_v9  ;;  %v2756_v20 = vpop.f32.mrb[53].mxu1  ;;  %v2880_v30 = vsel %vm838_vm5, %v2868_v13, 0.0 }
 0xa83   :  { %v2878_v23 = vsel %vm838_vm5, %v2867_v14, 0.0  ;;  %v2861_v24 = vadd.f32 %v2842_v16, %v2756_v20  ;;  %v3911_v16 = vld [vmem:[%s5418_s3 + $0x2b0] sm:$0xff] }
 0xa84   :  { %v2879_v26 = vadd.f32 %v2878_v23, %v2877_v18  ;;  %v2870_v27 = vmax.f32 %v2862_v19, 0.0  ;;  %v3912_v18 = vld [vmem:[%s5418_s3 + $0x2b8] sm:$0xff] }
 0xa85   :  { %v2869_v28 = vmax.f32 %v2861_v24, 0.0  ;;  %v3186_v29 = vpop.f32.mrb[54].mxu1  ;;  %v4571_v20 = vpack.c.bf16 %v3912_v18, %v3911_v16  ;;  %v3522_v24 = vld [vmem:[%s5419_s4 + $0x30] sm:$0xff] }
 0xa86   :  { %v2881_v31 = vadd.f32 %v2880_v30, %v2879_v26  ;;  %v4393_v32 = vpop.f32.mrb[55].mxu1  ;;  %v2884_v40 = vsel %vm838_vm5, %v2870_v27, 0.0  ;;  %v3193_v46 = vrot.slane %v3186_v29, %v4824_v25  ;;  %v3914_v25 = vld [vmem:[%s5418_s3 + $0x2c8] sm:$0xff]  ;;  %v3523_v26 = vld [vmem:[%s5419_s4 + $0x38] sm:$0xff]  ;;  %v3919_v29 = vld [vmem:[%s5418_s3 + $0x2e0] sm:$0xff] }
 0xa87   :  { %v2882_v33 = vsel %vm838_vm5, %v2869_v28, 0.0  ;;  %v4568_v56 = vpack.c.bf16 %v3914_v25, %v3913_v55  ;;  %v4580_v30 = vpack.c.bf16 %v3523_v26, %v3522_v24  ;;  %v3918_v28 = vld [vmem:[%s5418_s3 + $0x2d8] sm:$0xff]  ;;  %v3921_v32 = vld [vmem:[%s5418_s3 + $0x2f0] sm:$0xff] }
 0xa88   :  { %v2883_v35 = vadd.f32 %v2882_v33, %v2881_v31  ;;  %v4574_v31 = vpack.c.bf16 %v3919_v29, %v3918_v28 }
 0xa89   :  { %4569 = vmatpush3.bf16.msra.mxu1 %v4568_v56 }
 0xa8a   :  { %v2885_v41 = vadd.f32 %v2884_v40, %v2883_v35  ;;  %4570 = vmatprep.subr.bf16.mxu1 %v4619_v17  ;;  %v3917_v40 = vld [vmem:[%s5418_s3 + $0x2d0] sm:$0x1] }
 0xa8c   :  { %v2886_v42 = vmul.f32 0.125, %v2885_v41 }
 0xa8e   :  { %4367 = vmatmul.mubr.msk.f32.vlgmr.msra.gmra.mrb[38].mxu0 %vm838_vm5, %v2886_v42  ;;  %v3924_v42 = vld [vmem:[%s5419_s4 + $0x40] ss:$0 sm:$0xff] }
 0xa8f   :  { %4551 = vmatpush3.bf16.msra.mxu0 %v4550_v44  ;;  %4377 = vmatprep.mubr.msk.f32.mxu0 %vm4618_vm1, %v4617_v2 }
 0xa90   :  { %4552 = vmatprep.subr.bf16.mxu0 %v4619_v17 }
 0xa93   :  { %4554 = vmatpush3.bf16.msra.mxu0 %v4553_v45 }
 0xa94   :  { %4555 = vmatprep.subr.bf16.mxu0 %v4619_v17 }
 0xb61   :  { %v2965_v60 = vpop.f32.mrb[38].mxu0 }
 0xb62   :  { %v2966_v6 = vadd.f32 %v3889_v57, %v2965_v60  ;;  %v4368_v8 = vpop.f32.mrb[39].mxu0  ;;  %v3605_v57 = vld [vmem:[%s5419_s4 + $0x50] sm:$0xff] }
 0xb64   :  { %4378 = vmatmul.mubr.msk.f32.vlgmr.msra.gmra.mrb[40].mxu0 %vm838_vm5, %v2966_v6 }
 0xb65   :  { %4557 = vmatpush3.bf16.msra.mxu0 %v4556_v3  ;;  %4384 = vmatprep.mubr.msk.f32.mxu0 %vm4618_vm1, %v4617_v2  ;;  %v3922_v3 = vld [vmem:[%s5418_s3 + $0x2f8] sm:$0x1] }
 0xb66   :  { %4561 = vmatprep.subr.bf16.mxu0 %v4619_v17 }
 0xb68   :  { %4385 = vmatmul.mubr.msk.f32.vlgmr.msra.gmra.mrb[42].mxu0 %vm355_vm4, %v5068_v22 }
 0xb69   :  { %4402 = vmatprep.mubr.msk.f32.mxu0 %vm4618_vm1, %v4617_v2  ;;  %4563 = vmatpush3.bf16.msra.mxu0 %v4562_v54  ;;  %v3683_v54 = vld [vmem:[%s5419_s4 + $0x68] sm:$0xff] }
 0xb6a   :  { %4564 = vmatprep.subr.bf16.mxu0 %v4619_v17 }
 0xb6d   :  { %4566 = vmatpush3.bf16.msra.mxu0 %v4565_v63 }
 0xb6e   :  { %4573 = vmatprep.subr.bf16.mxu0 %v4619_v17 }
 0xc37   :  { %v3044_v0 = vpop.f32.mrb[40].mxu0 }
 0xc38   :  { %v4379_v5 = vpop.f32.mrb[41].mxu0 }
 0xc3b   :  { %v3114_v7 = vpop.f32.mrb[42].mxu0 }
 0xc3c   :  { %v3115_v39 = vadd.f32 %v3114_v7, %v3044_v0  ;;  %v4386_v47 = vpop.f32.mrb[43].mxu0 }
 0xc3e   :  { %v3194_v49 = vadd.f32 %v3193_v46, %v3115_v39  ;;  %v3684_v46 = vld [vmem:[%s5419_s4 + $0x70] sm:$0x1] }
 0xc40   :  { %v3200_v51 = vadd.f32 %v3903_v48, %v3194_v49 }
 0xc42   :  { %v3201_v53 = vmax.f32 %v3200_v51, 0.0 }
 0xc44   :  { %4403 = vmatmul.mubr.msk.f32.vlgmr.msra.gmra.mrb[44].mxu0 %vm838_vm5, %v3201_v53 }
 0xc45   :  { %4427 = vmatprep.mubr.msk.f32.mxu0 %vm4618_vm1, %v4617_v2  ;;  %4575 = vmatpush3.bf16.msra.mxu0 %v4574_v31 }
 0xc46   :  { %4576 = vmatprep.subr.bf16.mxu0 %v4619_v17 }
 0xd17   :  { %v3280_v62 = vpop.f32.mrb[44].mxu0 }
 0xd18   :  { %v3281_v34 = vadd.f32 %v3909_v61, %v3280_v62  ;;  %v4404_v1 = vpop.f32.mrb[45].mxu0 }
 0xd1a   :  { %v3284_v4 = vsel %vm355_vm4, %v3281_v34, 0.0  ;;  %v3520_v27 = vadd.f32 %v3281_v34, %v5068_v22  ;;  %v3920_v22 = vld [vmem:[%s5418_s3 + $0x2e8] sm:$0xff] }
 0xd1b   :  { %v3285_v9 = vrot.slane %v3284_v4, 4  ;;  %v4577_v33 = vpack.c.bf16 %v3921_v32, %v3920_v22 }
 0xd1d   :  { %v3286_v12 = vadd.f32 %v3285_v9, %v3284_v4  ;;  %4578 = vmatpush3.bf16.msra.mxu0 %v4577_v33 }
 0xd1e   :  { %4585 = vmatprep.subr.bf16.mxu0 %v4619_v17 }
 0xd1f   :  { %v3287_v13 = vrot.slane %v3286_v12, 2 }
 0xd21   :  { %v3288_v14 = vadd.f32 %v3287_v13, %v3286_v12 }
 0xd23   :  { %v3289_v15 = vrot.slane %v3288_v14, 1 }
 0xd25   :  { %v3290_v19 = vadd.f32 %v3289_v15, %v3288_v14 }
 0xd27   :  { %v3291_v23 = vmul.f32 0.125, %v3290_v19 }
 0xd29   :  { %4410 = vmatmul.mubr.msk.f32.vlgmr.msra.gmra.mrb[56].mxu1 %vm355_vm4, %v3291_v23 }
 0xd2a   :  { %4572 = vmatpush3.bf16.msra.mxu1 %v4571_v20  ;;  %4416 = vmatprep.mubr.msk.f32.mxu1 %vm4618_vm1, %v4617_v2 }
 0xd2b   :  { %4579 = vmatprep.subr.bf16.mxu1 %v4619_v17 }
 0xd2d   :  { %4417 = vmatmul.mubr.msk.f32.vlgmr.msra.gmra.mrb[58].mxu1 %vm355_vm4, %v5095_v36 }
 0xd2e   :  { %4581 = vmatpush3.bf16.msra.mxu1 %v4580_v30  ;;  %4434 = vmatprep.mubr.msk.f32.mxu1 %vm4618_vm1, %v4617_v2 }
 0xd2f   :  { %4582 = vmatprep.subr.bf16.mxu1 %v4619_v17  ;;  %v3604_v17 = vld [vmem:[%s5419_s4 + $0x48] sm:$0xff] }
 0xd30   :  { %v4583_v60 = vpack.c.bf16 %v3605_v57, %v3604_v17 }
 0xd31   :  { %4435 = vmatmul.mubr.msk.f32.vlgmr.msra.gmra.mrb[60].mxu1 %vm355_vm4, %v3520_v27 }
 0xd32   :  { %4441 = vmatprep.mubr.msk.f32.mxu1 %vm4618_vm1, %v4617_v2  ;;  %4584 = vmatpush3.bf16.msra.mxu1 %v4583_v60 }
 0xdfc   :  { %v3365_v35 = vpop.f32.mrb[56].mxu1 }
 0xdfd   :  { %v4411_v37 = vpop.f32.mrb[57].mxu1 }
 0xe00   :  { %v3435_v38 = vpop.f32.mrb[58].mxu1 }
 0xe01   :  { %v3436_v41 = vadd.f32 %v3435_v38, %v3365_v35  ;;  %v4418_v44 = vpop.f32.mrb[59].mxu1 }
 0xe03   :  { %v3440_v21 = vadd.f32 %v3917_v40, %v3436_v41 }
 0xe04   :  { %v3598_v43 = vpop.f32.mrb[60].mxu1 }
 0xe05   :  { %v3441_v45 = vmax.f32 %v3440_v21, 0.0  ;;  %v3599_v50 = vadd.f32 %v3924_v42, %v3598_v43  ;;  %v4436_v52 = vpop.f32.mrb[61].mxu1 }
 0xe07   :  { %3603 = vst.msk [vmem:[%s5420_s5] sm:$0xff] %vm3602_vm6, %v3599_v50  ;;  %4428 = vmatmul.mubr.msk.f32.vlgmr.msra.gmra.mrb[46].mxu0 %vm838_vm5, %v3441_v45 }
 0xe08   :  { %4448 = vmatprep.mubr.msk.f32.mxu0 %vm4618_vm1, %v4617_v2  ;;  %v3682_v2 = vld [vmem:[%s5419_s4 + $0x60] sm:$0xff] }
 0xe09   :  { %v4586_v58 = vpack.c.bf16 %v3683_v54, %v3682_v2 }
 0xe0b   :  { %4587 = vmatpush3.bf16.msra.mxu0 %v4586_v58 }
 0xeda   :  { %v3516_v6 = vpop.f32.mrb[46].mxu0 }
 0xedb   :  { %v3517_v8 = vadd.f32 %v3922_v3, %v3516_v6  ;;  %v4429_v10 = vpop.f32.mrb[47].mxu0 }
 0xedd   :  { %v3521_v11 = vadd.f32 %v3517_v8, %v5095_v36 }
 0xedf   :  { %4442 = vmatmul.mubr.msk.f32.vlgmr.msra.gmra.mrb[62].mxu1 %vm355_vm4, %v3521_v11 }
 0xfb2   :  { %v3676_v63 = vpop.f32.mrb[62].mxu1 }
 0xfb3   :  { %v3677_v0 = vadd.f32 %v3676_v63, %v3606_v59  ;;  %v4443_v5 = vpop.f32.mrb[63].mxu1 }
 0xfb5   :  { %v3680_v36 = vmul.f32 0.01, %v3677_v0 }
 0xfb7   :  { %v3681_v7 = vmax.f32 %v3677_v0, %v3680_v36 }
 0xfb9   :  { %4449 = vmatmul.mubr.msk.f32.vlgmr.msra.gmra.mrb[48].mxu0 %vm355_vm4, %v3681_v7 }
0x108c   :  { %v3754_v39 = vpop.f32.mrb[48].mxu0 }
0x108d   :  { %v3755_v47 = vadd.f32 %v3754_v39, %v3684_v46  ;;  %v4450_v48 = vpop.f32.mrb[49].mxu0 }
0x108f   :  { %3759 = vst.msk [vmem:[#allocation2] sm:$0x1] %vm3758_vm7, %v3755_v47 }
0x1090   :  { %4604 = shalt.err (!%p4601_p4)
}
0x1091   :  { %s4605_s4 = scalar_lea.hbm %s5421_s6, 16 }
0x1092   :  { %p4606_p5 = scmp.ne.s32.totalorder %s5421_s6, %s4605_s4  ;;  %p4609_p6 = scmp.lt.u32.totalorder %s4605_s4, %s5421_s6 }
0x1094   :  { %p4611_p7 = pnand %p4609_p6, %p4606_p5 }
0x1096   :  { %4614 = shalt.err (!%p4611_p7)
}
0x1097   :  { %3771 = dma.vmem_to_hbm [thread:$0]  %s3769_s22, 16, %s5421_s6, [#allocation3]  }
0x1098   :  { %4615 = dma.done.wait [#allocation3], 16  }
0x1099   :  { %4616 = vsyncadd [#allocation3], 4294967280 }
0x109a   :  { %3777 = vsyncpa [#allocation3], 1 }

</bundles_post_ra>
